<compile_context>
chip_gen: v6e
topology: v6e:2x2x1
jax: 0.10.0
libtpu: 0.0.40
codegen_flags: <defaults>
</compile_context>

<pallas_src>
import jax
import jax.numpy as jnp
from jax.experimental import pallas as pl
from jax.experimental.pallas import tpu as pltpu


def _round_up(x, m):
    return (x + m - 1) // m * m


def vae_kernel(x_ref, noise_ref,
               w1_ref, b1_ref, w2_ref, b2_ref,
               w3m_ref, b3m_ref, w3s_ref, b3s_ref,
               w4_ref, b4_ref, w5_ref, b5_ref, w6_ref, b6_ref,
               xhat_ref, mu_ref, sigma_ref):
    x = x_ref[...]                                            # [TB, 784] f32

    def dense(a_f32, w_ref, b_ref):
        # bf16 x bf16 -> f32 accumulation on the MXU, bias add in f32.
        y = jnp.dot(a_f32.astype(jnp.bfloat16), w_ref[...],
                    preferred_element_type=jnp.float32)
        return y + b_ref[...]

    # ---- encoder: 784 -> 256 -> 64 -> (10 | 10), ReLU after every layer ----
    h1 = jnp.maximum(dense(x, w1_ref, b1_ref), 0.0)           # [TB, 256]
    h2 = jnp.maximum(dense(h1, w2_ref, b2_ref), 0.0)          # [TB, 64]
    mu = jnp.maximum(dense(h2, w3m_ref, b3m_ref), 0.0)        # [TB, 10]
    sigma = jnp.maximum(dense(h2, w3s_ref, b3s_ref), 0.0)     # [TB, 10]

    # ---- reparameterization ----
    h = mu + sigma * noise_ref[...]                           # [TB, 10]

    # ---- decoder: 10 -> 64 -> 256 -> 784, ReLU, ReLU, Sigmoid ----
    d1 = jnp.maximum(dense(h, w4_ref, b4_ref), 0.0)           # [TB, 64]
    d2 = jnp.maximum(dense(d1, w5_ref, b5_ref), 0.0)          # [TB, 256]
    logits = dense(d2, w6_ref, b6_ref)                        # [TB, 784]
    xhat_ref[...] = jax.nn.sigmoid(logits)

    # mu / sigma go out so the (tiny) KL reduction happens in the wrapper,
    # keeping the batch grid axis "parallel" (no cross-step accumulator).
    mu_ref[...] = mu
    sigma_ref[...] = sigma


def vae_forward(x, noise, params, *, tb=256):
    """x: [B, 1, 28, 28] f32, noise: [B, 10] f32 (torch.randn_like equivalent)."""
    B = x.shape[0]
    x2 = x.reshape(B, 784).astype(jnp.float32)

    # Split layer-3 into lane-aligned mu / sigma halves (no in-kernel chunk).
    w1, b1, w2, b2, w3, b3, w4, b4, w5, b5, w6, b6 = params
    w3m, w3s = w3[:, :10], w3[:, 10:]
    b3m, b3s = b3[:, :10], b3[:, 10:]

    bf16 = lambda w: w.astype(jnp.bfloat16)
    weights = [bf16(w1), b1, bf16(w2), b2,
               bf16(w3m), b3m, bf16(w3s), b3s,
               bf16(w4), b4, bf16(w5), b5, bf16(w6), b6]

    # Batch tiling: TB rows per grid step (multiple of 8 sublanes; 256 feeds
    # the v6e/v7x MXU height, also fine on v5e as two 128-row passes).
    TB = tb if B >= tb else _round_up(B, 8)
    B_pad = _round_up(B, TB)
    noise = noise.astype(jnp.float32)
    if B_pad != B:
        x2 = jnp.pad(x2, ((0, B_pad - B), (0, 0)))
        noise = jnp.pad(noise, ((0, B_pad - B), (0, 0)))
    grid = (B_pad // TB,)

    def tile_spec(shape):
        return pl.BlockSpec(shape, lambda i: (i, 0))

    def resident_spec(arr):
        # Constant block index -> stays VMEM-resident across grid steps.
        return pl.BlockSpec(arr.shape, lambda i: (0, 0))

    in_specs = ([tile_spec((TB, 784)), tile_spec((TB, 10))]
                + [resident_spec(w) for w in weights])
    out_specs = (tile_spec((TB, 784)), tile_spec((TB, 10)), tile_spec((TB, 10)))
    out_shape = (jax.ShapeDtypeStruct((B_pad, 784), jnp.float32),
                 jax.ShapeDtypeStruct((B_pad, 10), jnp.float32),
                 jax.ShapeDtypeStruct((B_pad, 10), jnp.float32))

    xhat, mu, sigma = pl.pallas_call(
        vae_kernel,
        out_shape=out_shape,
        grid=grid,
        in_specs=in_specs,
        out_specs=out_specs,
        compiler_params=pltpu.CompilerParams(
            dimension_semantics=("parallel",),
            vmem_limit_bytes=32 * 1024 * 1024),
    )(x2, noise, *weights)

    xhat = xhat[:B].reshape(B, 1, 28, 28)
    mu, sigma = mu[:B], sigma[:B]

    # KL divergence (tiny [B,10] reduction, done outside the kernel by design).
    var = sigma * sigma
    kld = 0.5 * jnp.sum(mu * mu + var - jnp.log(1e-8 + var) - 1.0) / B / 28.0 / 28.0
    return xhat, kld


def init_params(key):
    """Deterministic init mimicking nn.Linear's U(-1/sqrt(fan_in), 1/sqrt(fan_in)).

    Weights stored as [in_features, out_features] so the kernel computes x @ W + b.
    """
    dims = [(784, 256), (256, 64), (64, 20),      # encoder
            (10, 64), (64, 256), (256, 784)]      # decoder
    params = []
    for i, (fin, fout) in enumerate(dims):
        kw, kb = jax.random.split(jax.random.fold_in(key, i))
        bound = 1.0 / float(fin) ** 0.5
        w = jax.random.uniform(kw, (fin, fout), jnp.float32, -bound, bound)
        b = jax.random.uniform(kb, (1, fout), jnp.float32, -bound, bound)
        params += [w, b]
    return params


if __name__ == "__main__":
    key = jax.random.PRNGKey(0)
    kx, kn, kp = jax.random.split(key, 3)
    B = 2
    x = jax.random.normal(kx, (B, 1, 28, 28), jnp.float32)
    # TODO(synk): torch.randn_like is sampled on host and passed in; values differ
    # from any particular torch seed but the distribution/semantics match.
    noise = jax.random.normal(kn, (B, 10), jnp.float32)
    params = init_params(kp)

    x_hat, kld = jax.jit(vae_forward)(x, noise, params)
    jax.block_until_ready((x_hat, kld))
    assert x_hat.shape == (B, 1, 28, 28) and x_hat.dtype == jnp.float32
    assert kld.shape == ()
    print("KERNEL_OK")
</pallas_src>

<mosaic_0001>
module attributes {stable_mosaic.version = 11 : i64} {
  func.func @vae_kernel(%arg0: i32, %arg1: memref<8x784xf32, #tpu.memory_space<vmem>>, %arg2: memref<8x10xf32, #tpu.memory_space<vmem>>, %arg3: memref<784x256xbf16, #tpu.memory_space<vmem>>, %arg4: memref<1x256xf32, #tpu.memory_space<vmem>>, %arg5: memref<256x64xbf16, #tpu.memory_space<vmem>>, %arg6: memref<1x64xf32, #tpu.memory_space<vmem>>, %arg7: memref<64x10xbf16, #tpu.memory_space<vmem>>, %arg8: memref<1x10xf32, #tpu.memory_space<vmem>>, %arg9: memref<64x10xbf16, #tpu.memory_space<vmem>>, %arg10: memref<1x10xf32, #tpu.memory_space<vmem>>, %arg11: memref<10x64xbf16, #tpu.memory_space<vmem>>, %arg12: memref<1x64xf32, #tpu.memory_space<vmem>>, %arg13: memref<64x256xbf16, #tpu.memory_space<vmem>>, %arg14: memref<1x256xf32, #tpu.memory_space<vmem>>, %arg15: memref<256x784xbf16, #tpu.memory_space<vmem>>, %arg16: memref<1x784xf32, #tpu.memory_space<vmem>>, %arg17: memref<8x784xf32, #tpu.memory_space<vmem>>, %arg18: memref<8x10xf32, #tpu.memory_space<vmem>>, %arg19: memref<8x10xf32, #tpu.memory_space<vmem>>) attributes {dimension_semantics = [#tpu.dimension_semantics<parallel>], iteration_bounds = array<i64: 1>, scalar_prefetch = 0 : i64, scratch_operands = 0 : i64, tpu.core_type = #tpu.core_type<tc>, window_params = [{transform_indices = @transform_0, window_bounds = array<i64: 8, 784>}, {transform_indices = @transform_1, window_bounds = array<i64: 8, 10>}, {pipeline_mode = #tpu.pipeline_mode<synchronous>, transform_indices = @transform_2, window_bounds = array<i64: 784, 256>}, {pipeline_mode = #tpu.pipeline_mode<synchronous>, transform_indices = @transform_3, window_bounds = array<i64: 1, 256>}, {pipeline_mode = #tpu.pipeline_mode<synchronous>, transform_indices = @transform_4, window_bounds = array<i64: 256, 64>}, {pipeline_mode = #tpu.pipeline_mode<synchronous>, transform_indices = @transform_5, window_bounds = array<i64: 1, 64>}, {pipeline_mode = #tpu.pipeline_mode<synchronous>, transform_indices = @transform_6, window_bounds = array<i64: 64, 10>}, {pipeline_mode = #tpu.pipeline_mode<synchronous>, transform_indices = @transform_7, window_bounds = array<i64: 1, 10>}, {pipeline_mode = #tpu.pipeline_mode<synchronous>, transform_indices = @transform_8, window_bounds = array<i64: 64, 10>}, {pipeline_mode = #tpu.pipeline_mode<synchronous>, transform_indices = @transform_9, window_bounds = array<i64: 1, 10>}, {pipeline_mode = #tpu.pipeline_mode<synchronous>, transform_indices = @transform_10, window_bounds = array<i64: 10, 64>}, {pipeline_mode = #tpu.pipeline_mode<synchronous>, transform_indices = @transform_11, window_bounds = array<i64: 1, 64>}, {pipeline_mode = #tpu.pipeline_mode<synchronous>, transform_indices = @transform_12, window_bounds = array<i64: 64, 256>}, {pipeline_mode = #tpu.pipeline_mode<synchronous>, transform_indices = @transform_13, window_bounds = array<i64: 1, 256>}, {pipeline_mode = #tpu.pipeline_mode<synchronous>, transform_indices = @transform_14, window_bounds = array<i64: 256, 784>}, {pipeline_mode = #tpu.pipeline_mode<synchronous>, transform_indices = @transform_15, window_bounds = array<i64: 1, 784>}, {transform_indices = @transform_16, window_bounds = array<i64: 8, 784>}, {transform_indices = @transform_17, window_bounds = array<i64: 8, 10>}, {transform_indices = @transform_18, window_bounds = array<i64: 8, 10>}]} {
    %c0 = arith.constant 0 : index
    %c0_0 = arith.constant 0 : index
    %0 = vector.load %arg1[%c0, %c0_0] : memref<8x784xf32, #tpu.memory_space<vmem>>, vector<8x784xf32>
    %1 = arith.truncf %0 : vector<8x784xf32> to vector<8x784xbf16>
    %c0_1 = arith.constant 0 : index
    %c0_2 = arith.constant 0 : index
    %2 = vector.load %arg3[%c0_1, %c0_2] : memref<784x256xbf16, #tpu.memory_space<vmem>>, vector<784x256xbf16>
    %cst = arith.constant dense<0.000000e+00> : vector<8x256xf32>
    %3 = tpu.matmul %1, %2, %cst {dimension_numbers = #tpu.dot_dimension_numbers<[1], [0], [0], [1], [0, 0, 1, 1], [], []>} : vector<8x784xbf16>, vector<784x256xbf16>, vector<8x256xf32> -> vector<8x256xf32>
    %c0_3 = arith.constant 0 : index
    %c0_4 = arith.constant 0 : index
    %4 = vector.load %arg4[%c0_3, %c0_4] : memref<1x256xf32, #tpu.memory_space<vmem>>, vector<1x256xf32>
    %5 = vector.broadcast %4 : vector<1x256xf32> to vector<8x256xf32>
    %6 = arith.addf %3, %5 : vector<8x256xf32>
    %cst_5 = arith.constant 0.000000e+00 : f32
    %7 = vector.broadcast %cst_5 : f32 to vector<8x256xf32>
    %8 = arith.maximumf %6, %7 : vector<8x256xf32>
    %9 = arith.truncf %8 : vector<8x256xf32> to vector<8x256xbf16>
    %c0_6 = arith.constant 0 : index
    %c0_7 = arith.constant 0 : index
    %10 = vector.load %arg5[%c0_6, %c0_7] : memref<256x64xbf16, #tpu.memory_space<vmem>>, vector<256x64xbf16>
    %cst_8 = arith.constant dense<0.000000e+00> : vector<8x64xf32>
    %11 = tpu.matmul %9, %10, %cst_8 {dimension_numbers = #tpu.dot_dimension_numbers<[1], [0], [0], [1], [0, 0, 1, 1], [], []>} : vector<8x256xbf16>, vector<256x64xbf16>, vector<8x64xf32> -> vector<8x64xf32>
    %c0_9 = arith.constant 0 : index
    %c0_10 = arith.constant 0 : index
    %12 = vector.load %arg6[%c0_9, %c0_10] : memref<1x64xf32, #tpu.memory_space<vmem>>, vector<1x64xf32>
    %13 = vector.broadcast %12 : vector<1x64xf32> to vector<8x64xf32>
    %14 = arith.addf %11, %13 : vector<8x64xf32>
    %cst_11 = arith.constant 0.000000e+00 : f32
    %15 = vector.broadcast %cst_11 : f32 to vector<8x64xf32>
    %16 = arith.maximumf %14, %15 : vector<8x64xf32>
    %17 = arith.truncf %16 : vector<8x64xf32> to vector<8x64xbf16>
    %c0_12 = arith.constant 0 : index
    %c0_13 = arith.constant 0 : index
    %18 = vector.load %arg7[%c0_12, %c0_13] : memref<64x10xbf16, #tpu.memory_space<vmem>>, vector<64x10xbf16>
    %cst_14 = arith.constant dense<0.000000e+00> : vector<8x10xf32>
    %19 = tpu.matmul %17, %18, %cst_14 {dimension_numbers = #tpu.dot_dimension_numbers<[1], [0], [0], [1], [0, 0, 1, 1], [], []>} : vector<8x64xbf16>, vector<64x10xbf16>, vector<8x10xf32> -> vector<8x10xf32>
    %c0_15 = arith.constant 0 : index
    %c0_16 = arith.constant 0 : index
    %20 = vector.load %arg8[%c0_15, %c0_16] : memref<1x10xf32, #tpu.memory_space<vmem>>, vector<1x10xf32>
    %21 = vector.broadcast %20 : vector<1x10xf32> to vector<8x10xf32>
    %22 = arith.addf %19, %21 : vector<8x10xf32>
    %cst_17 = arith.constant 0.000000e+00 : f32
    %23 = vector.broadcast %cst_17 : f32 to vector<8x10xf32>
    %24 = arith.maximumf %22, %23 : vector<8x10xf32>
    %25 = arith.truncf %16 : vector<8x64xf32> to vector<8x64xbf16>
    %c0_18 = arith.constant 0 : index
    %c0_19 = arith.constant 0 : index
    %26 = vector.load %arg9[%c0_18, %c0_19] : memref<64x10xbf16, #tpu.memory_space<vmem>>, vector<64x10xbf16>
    %cst_20 = arith.constant dense<0.000000e+00> : vector<8x10xf32>
    %27 = tpu.matmul %25, %26, %cst_20 {dimension_numbers = #tpu.dot_dimension_numbers<[1], [0], [0], [1], [0, 0, 1, 1], [], []>} : vector<8x64xbf16>, vector<64x10xbf16>, vector<8x10xf32> -> vector<8x10xf32>
    %c0_21 = arith.constant 0 : index
    %c0_22 = arith.constant 0 : index
    %28 = vector.load %arg10[%c0_21, %c0_22] : memref<1x10xf32, #tpu.memory_space<vmem>>, vector<1x10xf32>
    %29 = vector.broadcast %28 : vector<1x10xf32> to vector<8x10xf32>
    %30 = arith.addf %27, %29 : vector<8x10xf32>
    %cst_23 = arith.constant 0.000000e+00 : f32
    %31 = vector.broadcast %cst_23 : f32 to vector<8x10xf32>
    %32 = arith.maximumf %30, %31 : vector<8x10xf32>
    %c0_24 = arith.constant 0 : index
    %c0_25 = arith.constant 0 : index
    %33 = vector.load %arg2[%c0_24, %c0_25] : memref<8x10xf32, #tpu.memory_space<vmem>>, vector<8x10xf32>
    %34 = arith.mulf %32, %33 : vector<8x10xf32>
    %35 = arith.addf %24, %34 : vector<8x10xf32>
    %36 = arith.truncf %35 : vector<8x10xf32> to vector<8x10xbf16>
    %c0_26 = arith.constant 0 : index
    %c0_27 = arith.constant 0 : index
    %37 = vector.load %arg11[%c0_26, %c0_27] : memref<10x64xbf16, #tpu.memory_space<vmem>>, vector<10x64xbf16>
    %cst_28 = arith.constant dense<0.000000e+00> : vector<8x64xf32>
    %38 = tpu.matmul %36, %37, %cst_28 {dimension_numbers = #tpu.dot_dimension_numbers<[1], [0], [0], [1], [0, 0, 1, 1], [], []>} : vector<8x10xbf16>, vector<10x64xbf16>, vector<8x64xf32> -> vector<8x64xf32>
    %c0_29 = arith.constant 0 : index
    %c0_30 = arith.constant 0 : index
    %39 = vector.load %arg12[%c0_29, %c0_30] : memref<1x64xf32, #tpu.memory_space<vmem>>, vector<1x64xf32>
    %40 = vector.broadcast %39 : vector<1x64xf32> to vector<8x64xf32>
    %41 = arith.addf %38, %40 : vector<8x64xf32>
    %cst_31 = arith.constant 0.000000e+00 : f32
    %42 = vector.broadcast %cst_31 : f32 to vector<8x64xf32>
    %43 = arith.maximumf %41, %42 : vector<8x64xf32>
    %44 = arith.truncf %43 : vector<8x64xf32> to vector<8x64xbf16>
    %c0_32 = arith.constant 0 : index
    %c0_33 = arith.constant 0 : index
    %45 = vector.load %arg13[%c0_32, %c0_33] : memref<64x256xbf16, #tpu.memory_space<vmem>>, vector<64x256xbf16>
    %cst_34 = arith.constant dense<0.000000e+00> : vector<8x256xf32>
    %46 = tpu.matmul %44, %45, %cst_34 {dimension_numbers = #tpu.dot_dimension_numbers<[1], [0], [0], [1], [0, 0, 1, 1], [], []>} : vector<8x64xbf16>, vector<64x256xbf16>, vector<8x256xf32> -> vector<8x256xf32>
    %c0_35 = arith.constant 0 : index
    %c0_36 = arith.constant 0 : index
    %47 = vector.load %arg14[%c0_35, %c0_36] : memref<1x256xf32, #tpu.memory_space<vmem>>, vector<1x256xf32>
    %48 = vector.broadcast %47 : vector<1x256xf32> to vector<8x256xf32>
    %49 = arith.addf %46, %48 : vector<8x256xf32>
    %cst_37 = arith.constant 0.000000e+00 : f32
    %50 = vector.broadcast %cst_37 : f32 to vector<8x256xf32>
    %51 = arith.maximumf %49, %50 : vector<8x256xf32>
    %52 = arith.truncf %51 : vector<8x256xf32> to vector<8x256xbf16>
    %c0_38 = arith.constant 0 : index
    %c0_39 = arith.constant 0 : index
    %53 = vector.load %arg15[%c0_38, %c0_39] : memref<256x784xbf16, #tpu.memory_space<vmem>>, vector<256x784xbf16>
    %cst_40 = arith.constant dense<0.000000e+00> : vector<8x784xf32>
    %54 = tpu.matmul %52, %53, %cst_40 {dimension_numbers = #tpu.dot_dimension_numbers<[1], [0], [0], [1], [0, 0, 1, 1], [], []>} : vector<8x256xbf16>, vector<256x784xbf16>, vector<8x784xf32> -> vector<8x784xf32>
    %c0_41 = arith.constant 0 : index
    %c0_42 = arith.constant 0 : index
    %55 = vector.load %arg16[%c0_41, %c0_42] : memref<1x784xf32, #tpu.memory_space<vmem>>, vector<1x784xf32>
    %56 = vector.broadcast %55 : vector<1x784xf32> to vector<8x784xf32>
    %57 = arith.addf %54, %56 : vector<8x784xf32>
    %58 = arith.negf %57 : vector<8x784xf32>
    %59 = math.exp %58 : vector<8x784xf32>
    %cst_43 = arith.constant 1.000000e+00 : f32
    %60 = vector.broadcast %cst_43 : f32 to vector<8x784xf32>
    %61 = arith.addf %60, %59 : vector<8x784xf32>
    %62 = arith.divf %60, %61 : vector<8x784xf32>
    %c0_44 = arith.constant 0 : index
    %c0_45 = arith.constant 0 : index
    %63 = vector.load %arg17[%c0_44, %c0_45] : memref<8x784xf32, #tpu.memory_space<vmem>>, vector<8x784xf32>
    tpu.vector_store %arg17[%c0_44, %c0_45], %62 {strides = array<i32>} : memref<8x784xf32, #tpu.memory_space<vmem>>, vector<8x784xf32>,
    %c0_46 = arith.constant 0 : index
    %c0_47 = arith.constant 0 : index
    %64 = vector.load %arg18[%c0_46, %c0_47] : memref<8x10xf32, #tpu.memory_space<vmem>>, vector<8x10xf32>
    tpu.vector_store %arg18[%c0_46, %c0_47], %24 {strides = array<i32>} : memref<8x10xf32, #tpu.memory_space<vmem>>, vector<8x10xf32>,
    %c0_48 = arith.constant 0 : index
    %c0_49 = arith.constant 0 : index
    %65 = vector.load %arg19[%c0_48, %c0_49] : memref<8x10xf32, #tpu.memory_space<vmem>>, vector<8x10xf32>
    tpu.vector_store %arg19[%c0_48, %c0_49], %32 {strides = array<i32>} : memref<8x10xf32, #tpu.memory_space<vmem>>, vector<8x10xf32>,
    return
  }
  func.func @transform_0(%arg0: i32) -> (i32, i32) {
    %c0_i32 = arith.constant 0 : i32
    %c0_i32_0 = arith.constant 0 : i32
    return %arg0, %c0_i32 : i32, i32
  }
  func.func @transform_1(%arg0: i32) -> (i32, i32) {
    %c0_i32 = arith.constant 0 : i32
    %c0_i32_0 = arith.constant 0 : i32
    return %arg0, %c0_i32 : i32, i32
  }
  func.func @transform_2(%arg0: i32) -> (i32, i32) {
    %c0_i32 = arith.constant 0 : i32
    %c0_i32_0 = arith.constant 0 : i32
    %c0_i32_1 = arith.constant 0 : i32
    return %c0_i32, %c0_i32_0 : i32, i32
  }
  func.func @transform_3(%arg0: i32) -> (i32, i32) {
    %c0_i32 = arith.constant 0 : i32
    %c0_i32_0 = arith.constant 0 : i32
    %c0_i32_1 = arith.constant 0 : i32
    return %c0_i32, %c0_i32_0 : i32, i32
  }
  func.func @transform_4(%arg0: i32) -> (i32, i32) {
    %c0_i32 = arith.constant 0 : i32
    %c0_i32_0 = arith.constant 0 : i32
    %c0_i32_1 = arith.constant 0 : i32
    return %c0_i32, %c0_i32_0 : i32, i32
  }
  func.func @transform_5(%arg0: i32) -> (i32, i32) {
    %c0_i32 = arith.constant 0 : i32
    %c0_i32_0 = arith.constant 0 : i32
    %c0_i32_1 = arith.constant 0 : i32
    return %c0_i32, %c0_i32_0 : i32, i32
  }
  func.func @transform_6(%arg0: i32) -> (i32, i32) {
    %c0_i32 = arith.constant 0 : i32
    %c0_i32_0 = arith.constant 0 : i32
    %c0_i32_1 = arith.constant 0 : i32
    return %c0_i32, %c0_i32_0 : i32, i32
  }
  func.func @transform_7(%arg0: i32) -> (i32, i32) {
    %c0_i32 = arith.constant 0 : i32
    %c0_i32_0 = arith.constant 0 : i32
    %c0_i32_1 = arith.constant 0 : i32
    return %c0_i32, %c0_i32_0 : i32, i32
  }
  func.func @transform_8(%arg0: i32) -> (i32, i32) {
    %c0_i32 = arith.constant 0 : i32
    %c0_i32_0 = arith.constant 0 : i32
    %c0_i32_1 = arith.constant 0 : i32
    return %c0_i32, %c0_i32_0 : i32, i32
  }
  func.func @transform_9(%arg0: i32) -> (i32, i32) {
    %c0_i32 = arith.constant 0 : i32
    %c0_i32_0 = arith.constant 0 : i32
    %c0_i32_1 = arith.constant 0 : i32
    return %c0_i32, %c0_i32_0 : i32, i32
  }
  func.func @transform_10(%arg0: i32) -> (i32, i32) {
    %c0_i32 = arith.constant 0 : i32
    %c0_i32_0 = arith.constant 0 : i32
    %c0_i32_1 = arith.constant 0 : i32
    return %c0_i32, %c0_i32_0 : i32, i32
  }
  func.func @transform_11(%arg0: i32) -> (i32, i32) {
    %c0_i32 = arith.constant 0 : i32
    %c0_i32_0 = arith.constant 0 : i32
    %c0_i32_1 = arith.constant 0 : i32
    return %c0_i32, %c0_i32_0 : i32, i32
  }
  func.func @transform_12(%arg0: i32) -> (i32, i32) {
    %c0_i32 = arith.constant 0 : i32
    %c0_i32_0 = arith.constant 0 : i32
    %c0_i32_1 = arith.constant 0 : i32
    return %c0_i32, %c0_i32_0 : i32, i32
  }
  func.func @transform_13(%arg0: i32) -> (i32, i32) {
    %c0_i32 = arith.constant 0 : i32
    %c0_i32_0 = arith.constant 0 : i32
    %c0_i32_1 = arith.constant 0 : i32
    return %c0_i32, %c0_i32_0 : i32, i32
  }
  func.func @transform_14(%arg0: i32) -> (i32, i32) {
    %c0_i32 = arith.constant 0 : i32
    %c0_i32_0 = arith.constant 0 : i32
    %c0_i32_1 = arith.constant 0 : i32
    return %c0_i32, %c0_i32_0 : i32, i32
  }
  func.func @transform_15(%arg0: i32) -> (i32, i32) {
    %c0_i32 = arith.constant 0 : i32
    %c0_i32_0 = arith.constant 0 : i32
    %c0_i32_1 = arith.constant 0 : i32
    return %c0_i32, %c0_i32_0 : i32, i32
  }
  func.func @transform_16(%arg0: i32) -> (i32, i32) {
    %c0_i32 = arith.constant 0 : i32
    %c0_i32_0 = arith.constant 0 : i32
    return %arg0, %c0_i32 : i32, i32
  }
  func.func @transform_17(%arg0: i32) -> (i32, i32) {
    %c0_i32 = arith.constant 0 : i32
    %c0_i32_0 = arith.constant 0 : i32
    return %arg0, %c0_i32 : i32, i32
  }
  func.func @transform_18(%arg0: i32) -> (i32, i32) {
    %c0_i32 = arith.constant 0 : i32
    %c0_i32_0 = arith.constant 0 : i32
    return %arg0, %c0_i32 : i32, i32
  }
}

</mosaic_0001>

<bundles_post_ra>
// kernel: vae_forward.1
= control target key start
LH: loop header
LB: loop body
LE: loop exit
PB: predicated region body
PF: predicated region fallthrough
CT: control target
= control target key end

     0   :  { %vm671_vm0 = vcmask 130048   ;;  %vm3049_vm1 = vmmov 0   ;;  %vm1059_vm2 = vcmask 523264   ;;  %vm1206_vm3 = vcmask 1044480   ;;  %s4005_s2 = inlined_call_operand.vmem [shape: bf16[784,256], index: 2, kind: input, shape index: {}]   ;;  %s4006_s0 = inlined_call_operand.vmem [shape: f32[8,784], index: 0, kind: input, shape index: {}]   ;;  %s4007_s4 = inlined_call_operand.vmem [shape: bf16[256,64], index: 4, kind: input, shape index: {}]   ;;  %s4008_s6 = inlined_call_operand.vmem [shape: bf16[64,10], index: 6, kind: input, shape index: {}]   ;;  %s4009_s3 = inlined_call_operand.vmem [shape: f32[1,256], index: 3, kind: input, shape index: {}]   ;;  %s4010_s8 = inlined_call_operand.vmem [shape: bf16[64,10], index: 8, kind: input, shape index: {}]   ;;  %s4011_s5 = inlined_call_operand.vmem [shape: f32[1,64], index: 5, kind: input, shape index: {}]   ;;  %s4012_s10 = inlined_call_operand.vmem [shape: bf16[10,64], index: 10, kind: input, shape index: {}]   ;;  %s4013_s12 = inlined_call_operand.vmem [shape: bf16[64,256], index: 12, kind: input, shape index: {}]   ;;  %s4014_s7 = inlined_call_operand.vmem [shape: f32[1,10], index: 7, kind: input, shape index: {}]   ;;  %s4015_s17 = inlined_call_operand.vmem [shape: f32[8,10], index: 17, kind: output, shape index: {1}]   ;;  %s4016_s9 = inlined_call_operand.vmem [shape: f32[1,10], index: 9, kind: input, shape index: {}]   ;;  %s4017_s1 = inlined_call_operand.vmem [shape: f32[8,10], index: 1, kind: input, shape index: {}]   ;;  %s4018_s18 = inlined_call_operand.vmem [shape: f32[8,10], index: 18, kind: output, shape index: {2}]   ;;  %s4019_s14 = inlined_call_operand.vmem [shape: bf16[256,784], index: 14, kind: input, shape index: {}]   ;;  %s4020_s11 = inlined_call_operand.vmem [shape: f32[1,64], index: 11, kind: input, shape index: {}]   ;;  %s4021_s13 = inlined_call_operand.vmem [shape: f32[1,256], index: 13, kind: input, shape index: {}]   ;;  %s4022_s15 = inlined_call_operand.vmem [shape: f32[1,784], index: 15, kind: input, shape index: {}]   ;;  %s4023_s16 = inlined_call_operand.vmem [shape: f32[8,784], index: 16, kind: output, shape index: {0}]  }
   0x1   :  { %4027 = sst [smem:[#allocation2_spill]] %s4005_s2  ;;  %vm1202_vm4 = vcmask 80896  }
   0x2   :  { %4028 = sst [smem:[#allocation3_spill]] %s4006_s0 }
   0x3   :  { %4029 = sst [smem:[#allocation4_spill]] %s4007_s4 }
   0x4   :  { %s4030_s29 = sld [smem:[#allocation2_spill]] }
   0x5   :  { %s4031_s23 = sld [smem:[#allocation3_spill]] }
   0x6   :  { %s4032_s25 = sld [smem:[#allocation4_spill]] }
   0xa   :  { %v2675_v0 = vld [vmem:[%s4030_s29 + $0x74] ss:$8 sps:$4 sm:$0xff]   ;;  %v2677_v1 = vld [vmem:[%s4030_s29 + $0x70] ss:$8 sps:$4 sm:$0xff]   ;;  %v2681_v4 = vld [vmem:[%s4030_s29 + $0x64] ss:$8 sps:$4 sm:$0xff]  }
   0xb   :  { %675 = vmatprep.subr.bf16.mxu0 %v2675_v0  ;;  %v2678_v2 = vld [vmem:[%s4030_s29 + $0x174] ss:$8 sps:$4 sm:$0xff]   ;;  %v2680_v3 = vld [vmem:[%s4030_s29 + $0x170] ss:$8 sps:$4 sm:$0xff]   ;;  %v2683_v5 = vld [vmem:[%s4030_s29 + $0x60] ss:$8 sps:$4 sm:$0xff]  }
   0xc   :  { %676 = vmatpush1.bf16.msra.mxu0 %v2677_v1  ;;  %716 = vmatprep.subr.bf16.mxu1 %v2678_v2  ;;  %v2684_v6 = vld [vmem:[%s4030_s29 + $0x164] ss:$8 sps:$4 sm:$0xff]   ;;  %v2686_v7 = vld [vmem:[%s4030_s29 + $0x160] ss:$8 sps:$4 sm:$0xff]   ;;  %v2687_v8 = vld [vmem:[%s4030_s29 + $0x54] ss:$8 sps:$4 sm:$0xff]  }
   0xd   :  { %717 = vmatpush1.bf16.msra.mxu1 %v2680_v3  ;;  %677 = vmatprep.subr.bf16.mxu0 %v2681_v4  ;;  %v2689_v9 = vld [vmem:[%s4030_s29 + $0x50] ss:$8 sps:$4 sm:$0xff]   ;;  %v2690_v10 = vld [vmem:[%s4030_s29 + $0x154] ss:$8 sps:$4 sm:$0xff]   ;;  %v2693_v11 = vld [vmem:[%s4030_s29 + $0x44] ss:$8 sps:$4 sm:$0xff]  }
   0xe   :  { %718 = vmatprep.subr.bf16.mxu1 %v2684_v6  ;;  %v2692_v12 = vld [vmem:[%s4030_s29 + $0x150] ss:$8 sps:$4 sm:$0xff]   ;;  %v2696_v13 = vld [vmem:[%s4030_s29 + $0x144] ss:$8 sps:$4 sm:$0xff]   ;;  %v2695_v14 = vld [vmem:[%s4030_s29 + $0x40] ss:$8 sps:$4 sm:$0xff]  }
   0xf   :  { %v2699_v15 = vld [vmem:[%s4030_s29 + $0x34] ss:$8 sps:$4 sm:$0xff]   ;;  %v2698_v16 = vld [vmem:[%s4030_s29 + $0x140] ss:$8 sps:$4 sm:$0xff]   ;;  %v2701_v18 = vld [vmem:[%s4030_s29 + $0x30] ss:$8 sps:$4 sm:$0xff]  }
  0x10   :  { %678 = vmatpush1.bf16.msra.mxu0 %v2683_v5  ;;  %v2702_v17 = vld [vmem:[%s4030_s29 + $0x134] ss:$8 sps:$4 sm:$0xff]   ;;  %v2705_v19 = vld [vmem:[%s4030_s29 + $0x24] ss:$8 sps:$4 sm:$0xff]   ;;  %v2704_v20 = vld [vmem:[%s4030_s29 + $0x130] ss:$8 sps:$4 sm:$0xff]  }
  0x11   :  { %679 = vmatprep.subr.bf16.mxu0 %v2687_v8  ;;  %719 = vmatpush1.bf16.msra.mxu1 %v2686_v7  ;;  %v2708_v21 = vld [vmem:[%s4030_s29 + $0x124] ss:$8 sps:$4 sm:$0xff]   ;;  %v2707_v22 = vld [vmem:[%s4030_s29 + $0x20] ss:$8 sps:$4 sm:$0xff]   ;;  %v2711_v23 = vld [vmem:[%s4030_s29 + $0x14] ss:$8 sps:$4 sm:$0xff]  }
  0x12   :  { %720 = vmatprep.subr.bf16.mxu1 %v2690_v10  ;;  %v2710_v24 = vld [vmem:[%s4030_s29 + $0x120] ss:$8 sps:$4 sm:$0xff]   ;;  %v2714_v25 = vld [vmem:[%s4030_s29 + $0x114] ss:$8 sps:$4 sm:$0xff]   ;;  %v2713_v26 = vld [vmem:[%s4030_s29 + $0x10] ss:$8 sps:$4 sm:$0xff]  }
  0x13   :  { %v2717_v27 = vld [vmem:[%s4030_s29 + $0x4] ss:$8 sps:$4 sm:$0xff]   ;;  %v2716_v28 = vld [vmem:[%s4030_s29 + $0x110] ss:$8 sps:$4 sm:$0xff]   ;;  %v2719_v30 = vld [vmem:[%s4030_s29] ss:$8 sps:$4 sm:$0xff]  }
  0x14   :  { %680 = vmatpush1.bf16.msra.mxu0 %v2689_v9  ;;  %v2720_v29 = vld [vmem:[%s4030_s29 + $0x104] ss:$8 sps:$4 sm:$0xff]   ;;  %v2723_v31 = vld [vmem:[%s4030_s29 + $0xf4] ss:$8 sps:$4 sm:$0xff]   ;;  %v2722_v32 = vld [vmem:[%s4030_s29 + $0x100] ss:$8 sps:$4 sm:$0xff]  }
  0x15   :  { %681 = vmatprep.subr.bf16.mxu0 %v2693_v11  ;;  %721 = vmatpush1.bf16.msra.mxu1 %v2692_v12  ;;  %v2726_v33 = vld [vmem:[%s4030_s29 + $0x1f4] ss:$8 sps:$4 sm:$0xff]   ;;  %v2725_v34 = vld [vmem:[%s4030_s29 + $0xf0] ss:$8 sps:$4 sm:$0xff]   ;;  %v2729_v35 = vld [vmem:[%s4030_s29 + $0xe4] ss:$8 sps:$4 sm:$0xff]  }
  0x16   :  { %722 = vmatprep.subr.bf16.mxu1 %v2696_v13  ;;  %v2728_v36 = vld [vmem:[%s4030_s29 + $0x1f0] ss:$8 sps:$4 sm:$0xff]   ;;  %v2732_v37 = vld [vmem:[%s4030_s29 + $0x1e4] ss:$8 sps:$4 sm:$0xff]   ;;  %v2731_v38 = vld [vmem:[%s4030_s29 + $0xe0] ss:$8 sps:$4 sm:$0xff]  }
  0x17   :  { %v2735_v39 = vld [vmem:[%s4030_s29 + $0xd4] ss:$8 sps:$4 sm:$0xff]   ;;  %v2734_v40 = vld [vmem:[%s4030_s29 + $0x1e0] ss:$8 sps:$4 sm:$0xff]   ;;  %v2737_v42 = vld [vmem:[%s4030_s29 + $0xd0] ss:$8 sps:$4 sm:$0xff]  }
  0x18   :  { %682 = vmatpush1.bf16.msra.mxu0 %v2695_v14  ;;  %v2738_v41 = vld [vmem:[%s4030_s29 + $0x1d4] ss:$8 sps:$4 sm:$0xff]   ;;  %v2741_v43 = vld [vmem:[%s4030_s29 + $0xc4] ss:$8 sps:$4 sm:$0xff]   ;;  %v2740_v44 = vld [vmem:[%s4030_s29 + $0x1d0] ss:$8 sps:$4 sm:$0xff]  }
  0x19   :  { %683 = vmatprep.subr.bf16.mxu0 %v2699_v15  ;;  %723 = vmatpush1.bf16.msra.mxu1 %v2698_v16  ;;  %v2744_v45 = vld [vmem:[%s4030_s29 + $0x1c4] ss:$8 sps:$4 sm:$0xff]   ;;  %v2743_v47 = vld [vmem:[%s4030_s29 + $0xc0] ss:$8 sps:$4 sm:$0xff]   ;;  %v2747_v49 = vld [vmem:[%s4030_s29 + $0xb4] ss:$8 sps:$4 sm:$0xff]  }
  0x1a   :  { %724 = vmatprep.subr.bf16.mxu1 %v2702_v17  ;;  %v58_v46 = vld [vmem:[%s4031_s23 + $0x8] sm:$0xff]  ;;  %v60_v50 = vld [vmem:[%s4031_s23 + $0x18] sm:$0xff]  ;;  %v57_v4 = vld [vmem:[%s4031_s23] sm:$0xff] }
  0x1b   :  { %v65_v48 = vpack.c.bf16 %v58_v46, %v58_v46  ;;  %v2746_v51 = vld [vmem:[%s4030_s29 + $0x1c0] ss:$8 sps:$4 sm:$0xff]   ;;  %v67_v52 = vpack.c.bf16 %v60_v50, %v60_v50  ;;  %v2750_v53 = vld [vmem:[%s4030_s29 + $0x1b4] ss:$8 sps:$4 sm:$0xff]   ;;  %v2749_v54 = vld [vmem:[%s4030_s29 + $0xb0] ss:$8 sps:$4 sm:$0xff]   ;;  %v64_v7 = vpack.c.bf16 %v57_v4, %v57_v4 }
  0x1c   :  { %684 = vmatpush1.bf16.msra.mxu0 %v2701_v18  ;;  %v2753_v55 = vld [vmem:[%s4030_s29 + $0xa4] ss:$8 sps:$4 sm:$0xff]   ;;  %v2752_v56 = vld [vmem:[%s4030_s29 + $0x1b0] ss:$8 sps:$4 sm:$0xff]   ;;  %v2755_v58 = vld [vmem:[%s4030_s29 + $0xa0] ss:$8 sps:$4 sm:$0xff]  }
  0x1d   :  { %685 = vmatprep.subr.bf16.mxu0 %v2705_v19  ;;  %725 = vmatpush1.bf16.msra.mxu1 %v2704_v20  ;;  %v2756_v57 = vld [vmem:[%s4030_s29 + $0x1a4] ss:$8 sps:$4 sm:$0xff]   ;;  %v2759_v59 = vld [vmem:[%s4030_s29 + $0x94] ss:$8 sps:$4 sm:$0xff]   ;;  %v2758_v60 = vld [vmem:[%s4030_s29 + $0x1a0] ss:$8 sps:$4 sm:$0xff]  }
  0x1e   :  { %726 = vmatprep.subr.bf16.mxu1 %v2708_v21  ;;  %707 = vmatprep.mubr.bf16.mxu0 %v65_v48  ;;  %v2762_v61 = vld [vmem:[%s4030_s29 + $0x194] ss:$8 sps:$4 sm:$0xff]   ;;  %v2761_v62 = vld [vmem:[%s4030_s29 + $0x90] ss:$8 sps:$4 sm:$0xff]   ;;  %v2765_v63 = vld [vmem:[%s4030_s29 + $0x84] ss:$8 sps:$4 sm:$0xff]  }
  0x1f   :  { %748 = vmatprep.mubr.bf16.mxu1 %v67_v52  ;;  %v2764_v0 = vld [vmem:[%s4030_s29 + $0x190] ss:$8 sps:$4 sm:$0xff]   ;;  %v2767_v1 = vld [vmem:[%s4030_s29 + $0x80] ss:$8 sps:$4 sm:$0xff]   ;;  %v2768_v2 = vld [vmem:[%s4030_s29 + $0x184] ss:$8 sps:$4 sm:$0xff]  }
  0x20   :  { %686 = vmatpush1.bf16.msra.mxu0 %v2707_v22  ;;  %v2770_v3 = vld [vmem:[%s4030_s29 + $0x180] ss:$8 sps:$4 sm:$0xff]   ;;  %v2773_v5 = vld [vmem:[%s4030_s29 + $0x274] ss:$8 sps:$4 sm:$0xff]   ;;  %v2771_v8 = vld [vmem:[%s4030_s29 + $0x270] ss:$8 sps:$4 sm:$0xff]  }
  0x21   :  { %687 = vmatprep.subr.bf16.mxu0 %v2711_v23  ;;  %727 = vmatpush1.bf16.msra.mxu1 %v2710_v24  ;;  %v59_v6 = vld [vmem:[%s4031_s23 + $0x10] sm:$0xff]  ;;  %v2776_v10 = vld [vmem:[%s4030_s29 + $0x264] ss:$8 sps:$4 sm:$0xff]   ;;  %v2774_v13 = vld [vmem:[%s4030_s29 + $0x260] ss:$8 sps:$4 sm:$0xff]   ;;  %v3047_v46 = vmov 0  }
  0x22   :  { %728 = vmatprep.subr.bf16.mxu1 %v2714_v25  ;;  %v66_v9 = vpack.c.bf16 %v59_v6, %v59_v6  ;;  %v62_v11 = vld [vmem:[%s4031_s23 + $0x28] sm:$0xff]  ;;  %v2779_v14 = vld [vmem:[%s4030_s29 + $0x254] ss:$8 sps:$4 sm:$0xff]   ;;  %v2777_v15 = vld [vmem:[%s4030_s29 + $0x250] ss:$8 sps:$4 sm:$0xff]  }
  0x23   :  { %v69_v12 = vpack.c.bf16 %v62_v11, %v62_v11  ;;  %v2782_v16 = vld [vmem:[%s4030_s29 + $0x244] ss:$8 sps:$4 sm:$0xff]   ;;  %v2780_v17 = vld [vmem:[%s4030_s29 + $0x240] ss:$8 sps:$4 sm:$0xff]   ;;  %v2785_v18 = vld [vmem:[%s4030_s29 + $0x234] ss:$8 sps:$4 sm:$0xff]  }
  0x24   :  { %688 = vmatpush1.bf16.msra.mxu0 %v2713_v26  ;;  %v2783_v19 = vld [vmem:[%s4030_s29 + $0x230] ss:$8 sps:$4 sm:$0xff]   ;;  %v2788_v20 = vld [vmem:[%s4030_s29 + $0x224] ss:$8 sps:$4 sm:$0xff]   ;;  %v2786_v21 = vld [vmem:[%s4030_s29 + $0x220] ss:$8 sps:$4 sm:$0xff]  }
  0x25   :  { %689 = vmatprep.subr.bf16.mxu0 %v2717_v27  ;;  %729 = vmatpush1.bf16.msra.mxu1 %v2716_v28  ;;  %v2791_v22 = vld [vmem:[%s4030_s29 + $0x214] ss:$8 sps:$4 sm:$0xff]   ;;  %v2789_v23 = vld [vmem:[%s4030_s29 + $0x210] ss:$8 sps:$4 sm:$0xff]   ;;  %v2794_v24 = vld [vmem:[%s4030_s29 + $0x204] ss:$8 sps:$4 sm:$0xff]  }
  0x26   :  { %730 = vmatprep.subr.bf16.mxu1 %v2720_v29  ;;  %v2792_v25 = vld [vmem:[%s4030_s29 + $0x200] ss:$8 sps:$4 sm:$0xff]   ;;  %v2797_v26 = vld [vmem:[%s4030_s29 + $0x2f4] ss:$8 sps:$4 sm:$0xff]   ;;  %v2795_v27 = vld [vmem:[%s4030_s29 + $0x2f0] ss:$8 sps:$4 sm:$0xff]  }
  0x27   :  { %v2800_v28 = vld [vmem:[%s4030_s29 + $0x2e4] ss:$8 sps:$4 sm:$0xff]   ;;  %v2798_v29 = vld [vmem:[%s4030_s29 + $0x2e0] ss:$8 sps:$4 sm:$0xff]   ;;  %v2823_v50 = vld [vmem:[%s4032_s25 + $0x38] sm:$0xff]  }
  0x28   :  { %690 = vmatpush1.bf16.msra.mxu0 %v2719_v30  ;;  %v2803_v30 = vld [vmem:[%s4030_s29 + $0x2d4] ss:$8 sps:$4 sm:$0xff]  }
  0x29   :  { %691 = vmatprep.subr.bf16.mxu0 %v2723_v31  ;;  %731 = vmatpush1.bf16.msra.mxu1 %v2722_v32  ;;  %v2801_v31 = vld [vmem:[%s4030_s29 + $0x2d0] ss:$8 sps:$4 sm:$0xff]   ;;  %v2806_v32 = vld [vmem:[%s4030_s29 + $0x2c4] ss:$8 sps:$4 sm:$0xff]  }
  0x2a   :  { %732 = vmatprep.subr.bf16.mxu1 %v2726_v33  ;;  %v2804_v33 = vld [vmem:[%s4030_s29 + $0x2c0] ss:$8 sps:$4 sm:$0xff]   ;;  %v2825_v52 = vld [vmem:[%s4032_s25 + $0x30] sm:$0xff]  }
  0x2c   :  { %692 = vmatpush2.bf16.msra.mxu0 %v2725_v34  ;;  %v2809_v34 = vld [vmem:[%s4030_s29 + $0x2b4] ss:$8 sps:$4 sm:$0xff]  }
  0x2d   :  { %693 = vmatprep.subr.bf16.mxu0 %v2729_v35  ;;  %733 = vmatpush2.bf16.msra.mxu1 %v2728_v36  ;;  %v2807_v35 = vld [vmem:[%s4030_s29 + $0x2b0] ss:$8 sps:$4 sm:$0xff]   ;;  %v2812_v36 = vld [vmem:[%s4030_s29 + $0x2a4] ss:$8 sps:$4 sm:$0xff]  }
  0x2e   :  { %734 = vmatprep.subr.bf16.mxu1 %v2732_v37  ;;  %v2810_v37 = vld [vmem:[%s4030_s29 + $0x2a0] ss:$8 sps:$4 sm:$0xff]  }
  0x30   :  { %694 = vmatpush2.bf16.msra.mxu0 %v2731_v38  ;;  %v2815_v38 = vld [vmem:[%s4030_s29 + $0x294] ss:$8 sps:$4 sm:$0xff]  }
  0x31   :  { %695 = vmatprep.subr.bf16.mxu0 %v2735_v39  ;;  %735 = vmatpush2.bf16.msra.mxu1 %v2734_v40  ;;  %v2813_v39 = vld [vmem:[%s4030_s29 + $0x290] ss:$8 sps:$4 sm:$0xff]   ;;  %v2818_v40 = vld [vmem:[%s4030_s29 + $0x284] ss:$8 sps:$4 sm:$0xff]  }
  0x32   :  { %736 = vmatprep.subr.bf16.mxu1 %v2738_v41  ;;  %v2816_v41 = vld [vmem:[%s4030_s29 + $0x280] ss:$8 sps:$4 sm:$0xff]  }
  0x34   :  { %696 = vmatpush2.bf16.msra.mxu0 %v2737_v42  ;;  %v61_v42 = vld [vmem:[%s4031_s23 + $0x20] sm:$0xff] }
  0x35   :  { %697 = vmatprep.subr.bf16.mxu0 %v2741_v43  ;;  %737 = vmatpush2.bf16.msra.mxu1 %v2740_v44  ;;  %v2821_v43 = vld [vmem:[%s4030_s29 + $0x304] ss:$8 sps:$4 sm:$0xff]   ;;  %v68_v44 = vpack.c.bf16 %v61_v42, %v61_v42  ;;  %v2426_v42 = vld [vmem:[%s4011_s5] ss:$0 sm:$0xff] }
  0x36   :  { %738 = vmatprep.subr.bf16.mxu1 %v2744_v45  ;;  %v2819_v45 = vld [vmem:[%s4030_s29 + $0x300] ss:$8 sps:$4 sm:$0xff]  }
  0x38   :  { %698 = vmatpush2.bf16.msra.mxu0 %v2743_v47  ;;  %v63_v47 = vld [vmem:[%s4031_s23 + $0x30] sm:$0xff] }
  0x39   :  { %699 = vmatprep.subr.bf16.mxu0 %v2747_v49  ;;  %739 = vmatpush2.bf16.msra.mxu1 %v2746_v51  ;;  %v70_v48 = vpack.c.bf16 %v63_v47, %v63_v47  ;;  %v2822_v49 = vld [vmem:[%s4032_s25 + $0x78] sm:$0xff]   ;;  %v2824_v51 = vld [vmem:[%s4032_s25 + $0x70] sm:$0xff]  }
  0x3a   :  { %740 = vmatprep.subr.bf16.mxu1 %v2750_v53  ;;  %v2826_v53 = vld [vmem:[%s4032_s25 + $0x68] sm:$0xff]  }
  0x3c   :  { %700 = vmatpush2.bf16.msra.mxu0 %v2749_v54  ;;  %v2827_v54 = vld [vmem:[%s4032_s25 + $0x28] sm:$0xff]  }
  0x3d   :  { %701 = vmatprep.subr.bf16.mxu0 %v2753_v55  ;;  %741 = vmatpush2.bf16.msra.mxu1 %v2752_v56  ;;  %v2828_v55 = vld [vmem:[%s4032_s25 + $0x60] sm:$0xff]  }
  0x3e   :  { %742 = vmatprep.subr.bf16.mxu1 %v2756_v57  ;;  %v2829_v56 = vld [vmem:[%s4032_s25 + $0x20] sm:$0xff]   ;;  %v2830_v57 = vld [vmem:[%s4032_s25 + $0x58] sm:$0xff]  }
  0x40   :  { %702 = vmatpush2.bf16.msra.mxu0 %v2755_v58  ;;  %v2831_v58 = vld [vmem:[%s4032_s25 + $0x18] sm:$0xff]  }
  0x41   :  { %703 = vmatprep.subr.bf16.mxu0 %v2759_v59  ;;  %743 = vmatpush2.bf16.msra.mxu1 %v2758_v60  ;;  %v2832_v59 = vld [vmem:[%s4032_s25 + $0x50] sm:$0xff]  }
  0x42   :  { %744 = vmatprep.subr.bf16.mxu1 %v2762_v61  ;;  %v2833_v60 = vld [vmem:[%s4032_s25 + $0x10] sm:$0xff]   ;;  %v2834_v61 = vld [vmem:[%s4032_s25 + $0x48] sm:$0xff]  }
  0x44   :  { %704 = vmatpush2.bf16.msra.mxu0 %v2761_v62  ;;  %v2835_v62 = vld [vmem:[%s4032_s25 + $0x8] sm:$0xff]  }
  0x45   :  { %705 = vmatprep.subr.bf16.mxu0 %v2765_v63  ;;  %745 = vmatpush2.bf16.msra.mxu1 %v2764_v0  ;;  %v2836_v63 = vld [vmem:[%s4032_s25 + $0x40] sm:$0xff]  }
  0x46   :  { %746 = vmatprep.subr.bf16.mxu1 %v2768_v2  ;;  %v2837_v0 = vld [vmem:[%s4032_s25] sm:$0xff]   ;;  %v171_v2 = vlaneseq }
  0x48   :  { %706 = vmatpush2.bf16.msra.mxu0 %v2767_v1  ;;  %v3048_v1 = vmov 0.0  }
  0x49   :  { %757 = vmatprep.subr.bf16.mxu0 %v2773_v5  ;;  %747 = vmatpush2.bf16.msra.mxu1 %v2770_v3  ;;  %v3512_v3 = vshrl.u32 %v171_v2, 7  ;;  %v169_v5 = vld [vmem:[%s4009_s3] sm:$0x3] }
  0x4a   :  { %2586 = vmatprep.subr.bf16.mxu1 %v2822_v49 }
  0x4b   :  { %708 = vmatmul.mubr.bf16.vlgmr.msra.gmra.mxu0 %v64_v7  ;;  %v3515_v4 = vsub.s32 0, %v3512_v3  ;;  %v3521_v6 = vsub.s32 1, %v3512_v3 }
  0x4c   :  { %758 = vmatpush1.bf16.msra.mxu0 %v2771_v8  ;;  %749 = vmatmul.mubr.bf16.vlgmr.msra.gmra.mxu1 %v66_v9 }
  0x4d   :  { %759 = vmatprep.subr.bf16.mxu0 %v2776_v10  ;;  %789 = vmatprep.mubr.bf16.mxu0 %v69_v12  ;;  %v174_v7 = vrot.slane %v169_v5, %v3515_v4  ;;  %v178_v8 = vrot.slane %v169_v5, %v3521_v6 }
  0x4e   :  { %2587 = vmatpush3.bf16.msra.mxu1 %v2823_v50  ;;  %v2842_v50 = vld [vmem:[%s4010_s8 + $0x18] sm:$0xff]  }
  0x4f   :  { %2588 = vmatprep.subr.bf16.mxu1 %v2824_v51 }
  0x50   :  { %760 = vmatpush1.bf16.msra.mxu0 %v2774_v13 }
  0x51   :  { %761 = vmatprep.subr.bf16.mxu0 %v2779_v14 }
  0x52   :  { %2589 = vmatpush3.bf16.msra.mxu1 %v2825_v52  ;;  %v2843_v52 = vld [vmem:[%s4010_s8 + $0x10] sm:$0xff]  }
  0x53   :  { %2590 = vmatprep.subr.bf16.mxu1 %v2826_v53  ;;  %v2844_v53 = vld [vmem:[%s4010_s8 + $0x8] sm:$0xff]  }
  0x54   :  { %762 = vmatpush1.bf16.msra.mxu0 %v2777_v15 }
  0x55   :  { %763 = vmatprep.subr.bf16.mxu0 %v2782_v16 }
  0x56   :  { %2591 = vmatpush3.bf16.msra.mxu1 %v2827_v54  ;;  %v2845_v54 = vld [vmem:[%s4010_s8] sm:$0xff]  }
  0x57   :  { %2592 = vmatprep.subr.bf16.mxu1 %v2828_v55  ;;  %v2846_v55 = vld [vmem:[%s4012_s10] sm:$0x1f]  }
  0x58   :  { %764 = vmatpush1.bf16.msra.mxu0 %v2780_v17 }
  0x59   :  { %765 = vmatprep.subr.bf16.mxu0 %v2785_v18 }
  0x5a   :  { %2593 = vmatpush3.bf16.msra.mxu1 %v2829_v56  ;;  %v1208_v56 = vsel %vm1206_vm3, %v2846_v55, 0 }
  0x5b   :  { %2594 = vmatprep.subr.bf16.mxu1 %v2830_v57  ;;  %v2849_v57 = vld [vmem:[%s4013_s12 + $0x34] ss:$8 sps:$4 sm:$0xff]  }
  0x5c   :  { %766 = vmatpush1.bf16.msra.mxu0 %v2783_v19 }
  0x5d   :  { %767 = vmatprep.subr.bf16.mxu0 %v2788_v20 }
  0x5e   :  { %2595 = vmatpush3.bf16.msra.mxu1 %v2831_v58  ;;  %v2443_v58 = vld [vmem:[%s4014_s7] ss:$0 sm:$0xff] }
  0x5f   :  { %2596 = vmatprep.subr.bf16.mxu1 %v2832_v59 }
  0x60   :  { %768 = vmatpush1.bf16.msra.mxu0 %v2786_v21 }
  0x61   :  { %769 = vmatprep.subr.bf16.mxu0 %v2791_v22 }
  0x62   :  { %2597 = vmatpush3.bf16.msra.mxu1 %v2833_v60 }
  0x63   :  { %2598 = vmatprep.subr.bf16.mxu1 %v2834_v61 }
  0x64   :  { %770 = vmatpush1.bf16.msra.mxu0 %v2789_v23 }
  0x65   :  { %771 = vmatprep.subr.bf16.mxu0 %v2794_v24 }
  0x66   :  { %2599 = vmatpush3.bf16.msra.mxu1 %v2835_v62 }
  0x67   :  { %2600 = vmatprep.subr.bf16.mxu1 %v2836_v63 }
  0x68   :  { %772 = vmatpush1.bf16.msra.mxu0 %v2792_v25 }
  0x69   :  { %773 = vmatprep.subr.bf16.mxu0 %v2797_v26 }
  0x6a   :  { %2601 = vmatpush3.bf16.msra.mxu1 %v2837_v0 }
  0x6b   :  { %2642 = vmatprep.subr.bf16.mxu1 %v3048_v1 }
  0x6c   :  { %774 = vmatpush2.bf16.msra.mxu0 %v2795_v27 }
  0x6d   :  { %775 = vmatprep.subr.bf16.mxu0 %v2800_v28 }
  0x70   :  { %776 = vmatpush2.bf16.msra.mxu0 %v2798_v29 }
  0x71   :  { %777 = vmatprep.subr.bf16.mxu0 %v2803_v30 }
  0x74   :  { %778 = vmatpush2.bf16.msra.mxu0 %v2801_v31 }
  0x75   :  { %779 = vmatprep.subr.bf16.mxu0 %v2806_v32 }
  0x78   :  { %780 = vmatpush2.bf16.msra.mxu0 %v2804_v33 }
  0x79   :  { %781 = vmatprep.subr.bf16.mxu0 %v2809_v34 }
  0x7c   :  { %782 = vmatpush2.bf16.msra.mxu0 %v2807_v35 }
  0x7d   :  { %783 = vmatprep.subr.bf16.mxu0 %v2812_v36  ;;  %v2838_v36 = vld [vmem:[%s4008_s6 + $0x18] sm:$0xff]  }
  0x80   :  { %784 = vmatpush2.bf16.msra.mxu0 %v2810_v37 }
  0x81   :  { %785 = vmatprep.subr.bf16.mxu0 %v2815_v38  ;;  %v2839_v38 = vld [vmem:[%s4008_s6 + $0x10] sm:$0xff]  }
  0x84   :  { %786 = vmatpush2.bf16.msra.mxu0 %v2813_v39  ;;  %v2840_v39 = vld [vmem:[%s4008_s6 + $0x8] sm:$0xff]  }
  0x85   :  { %787 = vmatprep.subr.bf16.mxu0 %v2818_v40  ;;  %v2841_v40 = vld [vmem:[%s4008_s6] sm:$0xff]  }
  0x88   :  { %788 = vmatpush2.bf16.msra.mxu0 %v2816_v41 }
  0x89   :  { %812 = vmatprep.subr.bf16.mxu0 %v2821_v43 }
  0x8b   :  { %790 = vmatmul.mubr.bf16.vlgmr.msra.gmra.mxu0 %v68_v44 }
  0x8c   :  { %813 = vmatpush1.bf16.msra.mxu0 %v2819_v45  ;;  %830 = vmatprep.mubr.bf16.mxu0 %v3047_v46 }
  0x8d   :  { %2666 = vmatprep.subr.bf16.mxu0 %v3048_v1 }
  0x93   :  { %2425 = vmatmul.mubr.msk.bf16.vlgmr.msra.gmra.mxu0 %vm671_vm0, %v70_v48 }
  0x94   :  { %2668 = vmatprep.mubr.msk.bf16.mxu0 %vm3049_vm1, %v3048_v1  ;;  %2667 = vmatpush3.bf16.msra.mxu0 %v1208_v56 }
  0x95   :  { %1323 = vmatprep.subr.bf16.mxu0 %v2849_v57  ;;  %v2862_v57 = vld [vmem:[%s4019_s14 + $0x190] ss:$28 sps:$4 sm:$0xff]  }
 0x10b   :  { %v709_v9 = vpop.f32.mrf.mxu0 }
 0x10c   :  { %v710_v10 = vadd.f32 %v709_v9, %v174_v7  ;;  %v750_v12 = vpop.f32.mrf.mxu1  ;;  %v1184_v7 = vld [vmem:[%s4017_s1] sm:$0xff] }
 0x10d   :  { %v711_v11 = vpop.f32.mrf.mxu0 }
 0x10e   :  { %v712_v13 = vadd.f32 %v711_v11, %v178_v8  ;;  %v751_v14 = vadd.f32 %v750_v12, %v710_v10  ;;  %v752_v16 = vpop.f32.mrf.mxu1 }
 0x10f   :  { %v713_v15 = vpop.f32.mrf.mxu0 }
 0x110   :  { %v753_v17 = vadd.f32 %v752_v16, %v712_v13  ;;  %v754_v19 = vpop.f32.mrf.mxu1  ;;  %v2852_v16 = vld [vmem:[%s4013_s12 + $0x24] ss:$8 sps:$4 sm:$0xff]  }
 0x111   :  { %v714_v18 = vpop.f32.mrf.mxu0  ;;  %v2853_v19 = vld [vmem:[%s4013_s12 + $0x10] ss:$8 sps:$4 sm:$0xff]  }
 0x112   :  { %v755_v20 = vpop.f32.mrf.mxu1  ;;  %v2855_v18 = vld [vmem:[%s4013_s12 + $0x14] ss:$8 sps:$4 sm:$0xff]  }
 0x113   :  { %v2858_v20 = vld [vmem:[%s4013_s12 + $0x4] ss:$8 sps:$4 sm:$0xff]  }
 0x14b   :  { %v791_v21 = vpop.f32.mrf.mxu0 }
 0x14c   :  { %v792_v25 = vadd.f32 %v791_v21, %v751_v14  ;;  %v2847_v14 = vld [vmem:[%s4013_s12 + $0x30] ss:$8 sps:$4 sm:$0xff]   ;;  %v2859_v21 = vld [vmem:[%s4019_s14 + $0x188] ss:$28 sps:$4 sm:$0xff]  }
 0x14d   :  { %v793_v22 = vpop.f32.mrf.mxu0 }
 0x14e   :  { %v794_v27 = vadd.f32 %v793_v22, %v753_v17  ;;  %v2850_v17 = vld [vmem:[%s4013_s12 + $0x20] ss:$8 sps:$4 sm:$0xff]  }
 0x14f   :  { %v795_v23 = vpop.f32.mrf.mxu0  ;;  %v2861_v22 = vld [vmem:[%s4019_s14 + $0x18c] ss:$28 sps:$4 sm:$0xff]  }
 0x150   :  { %v2864_v23 = vld [vmem:[%s4019_s14 + $0x194] ss:$28 sps:$4 sm:$0xff]  }
 0x151   :  { %v796_v24 = vpop.f32.mrf.mxu0 }
 0x152   :  { %v2867_v24 = vld [vmem:[%s4019_s14 + $0x154] ss:$28 sps:$4 sm:$0xff]  }
 0x153   :  { %v832_v26 = vpop.f32.mrf.mxu0 }
 0x154   :  { %v833_v28 = vadd.f32 %v832_v26, %v792_v25  ;;  %v2865_v25 = vld [vmem:[%s4019_s14 + $0x150] ss:$28 sps:$4 sm:$0xff]   ;;  %v2873_v26 = vld [vmem:[%s4019_s14 + $0x11c] ss:$28 sps:$4 sm:$0xff]  }
 0x155   :  { %v834_v29 = vpop.f32.mrf.mxu0 }
 0x156   :  { %v835_v30 = vadd.f32 %v834_v29, %v794_v27  ;;  %v839_v31 = vmax.f32 %v833_v28, 0.0  ;;  %v2871_v27 = vld [vmem:[%s4019_s14 + $0x118] ss:$28 sps:$4 sm:$0xff]   ;;  %v2879_v28 = vld [vmem:[%s4019_s14 + $0xe4] ss:$28 sps:$4 sm:$0xff]  }
 0x157   :  { %v836_v32 = vpop.f32.mrf.mxu0  ;;  %v2877_v29 = vld [vmem:[%s4019_s14 + $0xe0] ss:$28 sps:$4 sm:$0xff]  }
 0x158   :  { %v840_v33 = vmax.f32 %v835_v30, 0.0  ;;  %v841_v37 = vpack.c.bf16 %v839_v31, %v839_v31  ;;  %v2885_v30 = vld [vmem:[%s4019_s14 + $0xac] ss:$28 sps:$4 sm:$0xff]   ;;  %v2891_v32 = vld [vmem:[%s4019_s14 + $0x74] ss:$28 sps:$4 sm:$0xff]  }
 0x159   :  { %v837_v34 = vpop.f32.mrf.mxu0  ;;  %v2883_v31 = vld [vmem:[%s4019_s14 + $0xa8] ss:$28 sps:$4 sm:$0xff]  }
 0x15a   :  { %v842_v35 = vpack.c.bf16 %v840_v33, %v840_v33  ;;  %v2889_v33 = vld [vmem:[%s4019_s14 + $0x70] ss:$28 sps:$4 sm:$0xff]   ;;  %v2897_v34 = vld [vmem:[%s4019_s14 + $0x3c] ss:$28 sps:$4 sm:$0xff]  }
 0x15c   :  { %1010 = vmatprep.mubr.bf16.mxu1 %v842_v35  ;;  %v2895_v35 = vld [vmem:[%s4019_s14 + $0x38] ss:$28 sps:$4 sm:$0xff]  }
 0x15d   :  { %1011 = vmatmul.mubr.bf16.vlgmr.msra.gmra.mxu1 %v841_v37  ;;  %v2901_v37 = vld [vmem:[%s4019_s14] ss:$28 sps:$4 sm:$0xff]  }
 0x15e   :  { %2643 = vmatpush3.bf16.msra.mxu1 %v2838_v36  ;;  %2650 = vmatprep.mubr.msk.bf16.mxu1 %vm3049_vm1, %v3048_v1  ;;  %v2903_v36 = vld [vmem:[%s4019_s14 + $0x4] ss:$28 sps:$4 sm:$0xff]  }
 0x15f   :  { %2644 = vmatprep.subr.bf16.mxu1 %v3048_v1 }
 0x162   :  { %2645 = vmatpush3.bf16.msra.mxu1 %v2839_v38  ;;  %v2909_v38 = vld [vmem:[%s4019_s14 + $0x34c] ss:$28 sps:$4 sm:$0xff]  }
 0x163   :  { %2646 = vmatprep.subr.bf16.mxu1 %v3048_v1 }
 0x166   :  { %2647 = vmatpush3.bf16.msra.mxu1 %v2840_v39  ;;  %v2907_v39 = vld [vmem:[%s4019_s14 + $0x348] ss:$28 sps:$4 sm:$0xff]  }
 0x167   :  { %2648 = vmatprep.subr.bf16.mxu1 %v3048_v1 }
 0x16a   :  { %2649 = vmatpush3.bf16.msra.mxu1 %v2841_v40  ;;  %v2915_v40 = vld [vmem:[%s4019_s14 + $0x314] ss:$28 sps:$4 sm:$0xff]  }
 0x16b   :  { %2654 = vmatprep.subr.bf16.mxu1 %v3048_v1 }
 0x21d   :  { %v2602_v41 = vpop.f32.mrf.mxu1 }
 0x21f   :  { %v2603_v43 = vpop.f32.mrf.mxu1 }
 0x220   :  { %v2604_v44 = vadd.f32 %v2603_v43, %v2602_v41  ;;  %v2913_v41 = vld [vmem:[%s4019_s14 + $0x310] ss:$28 sps:$4 sm:$0xff]   ;;  %v2919_v43 = vld [vmem:[%s4019_s14 + $0x2d8] ss:$28 sps:$4 sm:$0xff]  }
 0x221   :  { %v2605_v45 = vpop.f32.mrf.mxu1 }
 0x222   :  { %v1013_v47 = vadd.f32 %v2604_v44, %v2426_v42  ;;  %v2921_v42 = vld [vmem:[%s4019_s14 + $0x2dc] ss:$28 sps:$4 sm:$0xff]   ;;  %v2927_v44 = vld [vmem:[%s4019_s14 + $0x2a4] ss:$28 sps:$4 sm:$0xff]  }
 0x223   :  { %v2606_v48 = vpop.f32.mrf.mxu1  ;;  %v2925_v45 = vld [vmem:[%s4019_s14 + $0x2a0] ss:$28 sps:$4 sm:$0xff]  }
 0x224   :  { %v1018_v49 = vmax.f32 %v1013_v47, 0.0  ;;  %v2933_v47 = vld [vmem:[%s4019_s14 + $0x26c] ss:$28 sps:$4 sm:$0xff]  }
 0x225   :  { %v2931_v48 = vld [vmem:[%s4019_s14 + $0x268] ss:$28 sps:$4 sm:$0xff]  }
 0x226   :  { %v1019_v51 = vpack.c.bf16 %v1018_v49, %v1018_v49  ;;  %v2939_v49 = vld [vmem:[%s4019_s14 + $0x234] ss:$28 sps:$4 sm:$0xff]  }
 0x228   :  { %2651 = vmatmul.mubr.msk.bf16.vlgmr.msra.gmra.mxu1 %vm1059_vm2, %v1019_v51 }
 0x229   :  { %2655 = vmatpush3.bf16.msra.mxu1 %v2842_v50  ;;  %2662 = vmatprep.mubr.msk.bf16.mxu1 %vm3049_vm1, %v3048_v1  ;;  %v2937_v50 = vld [vmem:[%s4019_s14 + $0x230] ss:$28 sps:$4 sm:$0xff]  }
 0x22a   :  { %2656 = vmatprep.subr.bf16.mxu1 %v3048_v1 }
 0x22d   :  { %2657 = vmatpush3.bf16.msra.mxu1 %v2843_v52 }
 0x22e   :  { %2658 = vmatprep.subr.bf16.mxu1 %v3048_v1 }
 0x231   :  { %2659 = vmatpush3.bf16.msra.mxu1 %v2844_v53 }
 0x232   :  { %2660 = vmatprep.subr.bf16.mxu1 %v3048_v1  ;;  %v2449_v1 = vld [vmem:[%s4016_s9] ss:$0 sm:$0xff] }
 0x235   :  { %2661 = vmatpush3.bf16.msra.mxu1 %v2845_v54 }
 0x236   :  { %2101 = vmatprep.subr.bf16.mxu1 %v2861_v22  ;;  %v2942_v22 = vld [vmem:[%s4019_s14 + $0x23c] ss:$28 sps:$4 sm:$0xff]  }
 0x238   :  { %2663 = vmatmul.mubr.msk.bf16.vlgmr.msra.gmra.mxu1 %vm1059_vm2, %v1019_v51  ;;  %v2455_v51 = vld [vmem:[%s4020_s11] ss:$0 sm:$0xff] }
 0x239   :  { %2102 = vmatpush1.bf16.msra.mxu1 %v2859_v21  ;;  %v2934_v21 = vld [vmem:[%s4019_s14 + $0x270] ss:$28 sps:$4 sm:$0xff]  }
 0x23a   :  { %2103 = vmatprep.subr.bf16.mxu1 %v2867_v24  ;;  %v2945_v24 = vld [vmem:[%s4019_s14 + $0x1fc] ss:$28 sps:$4 sm:$0xff]  }
 0x23d   :  { %2104 = vmatpush1.bf16.msra.mxu1 %v2865_v25  ;;  %v2948_v25 = vld [vmem:[%s4019_s14 + $0x204] ss:$28 sps:$4 sm:$0xff]  }
 0x23e   :  { %2105 = vmatprep.subr.bf16.mxu1 %v2873_v26  ;;  %v2943_v26 = vld [vmem:[%s4019_s14 + $0x1f8] ss:$28 sps:$4 sm:$0xff]  }
 0x241   :  { %2106 = vmatpush1.bf16.msra.mxu1 %v2871_v27  ;;  %v2946_v27 = vld [vmem:[%s4019_s14 + $0x200] ss:$28 sps:$4 sm:$0xff]  }
 0x242   :  { %2107 = vmatprep.subr.bf16.mxu1 %v2879_v28  ;;  %v2951_v28 = vld [vmem:[%s4019_s14 + $0x1c4] ss:$28 sps:$4 sm:$0xff]  }
 0x245   :  { %2108 = vmatpush1.bf16.msra.mxu1 %v2877_v29  ;;  %v2954_v29 = vld [vmem:[%s4019_s14 + $0x1cc] ss:$28 sps:$4 sm:$0xff]  }
 0x246   :  { %2109 = vmatprep.subr.bf16.mxu1 %v2885_v30  ;;  %v2949_v30 = vld [vmem:[%s4019_s14 + $0x1c0] ss:$28 sps:$4 sm:$0xff]  }
 0x249   :  { %2110 = vmatpush1.bf16.msra.mxu1 %v2883_v31  ;;  %v2952_v31 = vld [vmem:[%s4019_s14 + $0x1c8] ss:$28 sps:$4 sm:$0xff]  }
 0x24a   :  { %2111 = vmatprep.subr.bf16.mxu1 %v2891_v32  ;;  %v2957_v32 = vld [vmem:[%s4019_s14 + $0x19c] ss:$28 sps:$4 sm:$0xff]  }
 0x24d   :  { %2112 = vmatpush1.bf16.msra.mxu1 %v2889_v33  ;;  %v2958_v33 = vld [vmem:[%s4019_s14 + $0x360] ss:$28 sps:$4 sm:$0xff]  }
 0x24e   :  { %2113 = vmatprep.subr.bf16.mxu1 %v2897_v34  ;;  %v1260_v34 = vld [vmem:[%s4021_s13] sm:$0x3] }
 0x251   :  { %2114 = vmatpush1.bf16.msra.mxu1 %v2895_v35  ;;  %v1265_v35 = vrot.slane %v1260_v34, %v3515_v4 }
 0x252   :  { %2115 = vmatprep.subr.bf16.mxu1 %v2903_v36  ;;  %v1269_v36 = vrot.slane %v1260_v34, %v3521_v6  ;;  %v1504_v34 = vsub.s32 3, %v3512_v3 }
 0x255   :  { %2116 = vmatpush1.bf16.msra.mxu1 %v2901_v37 }
 0x256   :  { %2117 = vmatprep.subr.bf16.mxu1 %v2909_v38 }
 0x259   :  { %2118 = vmatpush2.bf16.msra.mxu1 %v2907_v39 }
 0x25a   :  { %2119 = vmatprep.subr.bf16.mxu1 %v2915_v40 }
 0x25d   :  { %2120 = vmatpush2.bf16.msra.mxu1 %v2913_v41 }
 0x25e   :  { %2121 = vmatprep.subr.bf16.mxu1 %v2921_v42 }
 0x261   :  { %2122 = vmatpush2.bf16.msra.mxu1 %v2919_v43 }
 0x262   :  { %2123 = vmatprep.subr.bf16.mxu1 %v2927_v44 }
 0x265   :  { %2124 = vmatpush2.bf16.msra.mxu1 %v2925_v45 }
 0x266   :  { %2125 = vmatprep.subr.bf16.mxu1 %v2933_v47  ;;  %v2955_v47 = vld [vmem:[%s4019_s14 + $0x198] ss:$28 sps:$4 sm:$0xff]  }
 0x269   :  { %2126 = vmatpush2.bf16.msra.mxu1 %v2931_v48  ;;  %v2959_v48 = vld [vmem:[%s4019_s14 + $0x1a0] ss:$28 sps:$4 sm:$0xff]  }
 0x26a   :  { %2127 = vmatprep.subr.bf16.mxu1 %v2939_v49 }
 0x26d   :  { %2128 = vmatpush2.bf16.msra.mxu1 %v2937_v50  ;;  %v2962_v50 = vld [vmem:[%s4019_s14 + $0x164] ss:$28 sps:$4 sm:$0xff]  }
 0x26e   :  { %2129 = vmatprep.subr.bf16.mxu1 %v2945_v24  ;;  %v3009_v24 = vld [vmem:[%s4019_s14 + $0x27c] ss:$28 sps:$4 sm:$0xff]  }
 0x271   :  { %2130 = vmatpush2.bf16.msra.mxu1 %v2943_v26  ;;  %v3012_v26 = vld [vmem:[%s4019_s14 + $0x244] ss:$28 sps:$4 sm:$0xff]  }
 0x272   :  { %2131 = vmatprep.subr.bf16.mxu1 %v2951_v28  ;;  %v3015_v28 = vld [vmem:[%s4019_s14 + $0x20c] ss:$28 sps:$4 sm:$0xff]  }
 0x275   :  { %2132 = vmatpush2.bf16.msra.mxu1 %v2949_v30  ;;  %v3018_v30 = vld [vmem:[%s4019_s14 + $0x1d4] ss:$28 sps:$4 sm:$0xff]  }
 0x276   :  { %2183 = vmatprep.subr.bf16.mxu1 %v2957_v32  ;;  %v1500_v32 = vsub.s32 2, %v3512_v3 }
 0x2e8   :  { %v1097_v59 = vpop.f32.mrf.mxu1 }
 0x2e9   :  { %v1098_v60 = vadd.f32 %v2443_v58, %v1097_v59  ;;  %v2870_v59 = vld [vmem:[%s4019_s14 + $0x15c] ss:$28 sps:$4 sm:$0xff]  }
 0x2ea   :  { %v2652_v61 = vpop.f32.mrf.mxu1 }
 0x2eb   :  { %v1103_v62 = vmax.f32 %v1098_v60, 0.0  ;;  %v2868_v61 = vld [vmem:[%s4019_s14 + $0x158] ss:$28 sps:$4 sm:$0xff]  }
 0x2ec   :  { %v1100_v63 = vpop.f32.mrf.mxu1 }
 0x2ed   :  { %2313 = vst.msk [vmem:[%s4015_s17] sm:$0xff] %vm1202_vm4, %v1103_v62  ;;  %v2874_v63 = vld [vmem:[%s4019_s14 + $0x120] ss:$28 sps:$4 sm:$0xff]  }
 0x2ee   :  { %v2653_v0 = vpop.f32.mrf.mxu1 }
 0x2ef   :  { %v2882_v0 = vld [vmem:[%s4019_s14 + $0xec] ss:$28 sps:$4 sm:$0xff]  }
 0x2f8   :  { %v1177_v2 = vpop.f32.mrf.mxu1 }
 0x2f9   :  { %v1178_v5 = vadd.f32 %v2449_v1, %v1177_v2  ;;  %v2880_v1 = vld [vmem:[%s4019_s14 + $0xe8] ss:$28 sps:$4 sm:$0xff]   ;;  %v2888_v2 = vld [vmem:[%s4019_s14 + $0xb4] ss:$28 sps:$4 sm:$0xff]  }
 0x2fa   :  { %v2664_v8 = vpop.f32.mrf.mxu1 }
 0x2fb   :  { %v1183_v9 = vmax.f32 %v1178_v5, 0.0  ;;  %v2886_v5 = vld [vmem:[%s4019_s14 + $0xb0] ss:$28 sps:$4 sm:$0xff]   ;;  %v2892_v8 = vld [vmem:[%s4019_s14 + $0x78] ss:$28 sps:$4 sm:$0xff]  }
 0x2fc   :  { %v1180_v10 = vpop.f32.mrf.mxu1 }
 0x2fd   :  { %v1185_v11 = vmul.f32 %v1184_v7, %v1183_v9  ;;  %2314 = vst.msk [vmem:[%s4018_s18] sm:$0xff] %vm1202_vm4, %v1183_v9  ;;  %v2894_v7 = vld [vmem:[%s4019_s14 + $0x7c] ss:$28 sps:$4 sm:$0xff]   ;;  %v2900_v9 = vld [vmem:[%s4019_s14 + $0x44] ss:$28 sps:$4 sm:$0xff]  }
 0x2fe   :  { %v2665_v12 = vpop.f32.mrf.mxu1  ;;  %v2898_v10 = vld [vmem:[%s4019_s14 + $0x40] ss:$28 sps:$4 sm:$0xff]  }
 0x2ff   :  { %v1186_v13 = vadd.f32 %v1185_v11, %v1103_v62  ;;  %v2876_v62 = vld [vmem:[%s4019_s14 + $0x124] ss:$28 sps:$4 sm:$0xff]   ;;  %v2906_v11 = vld [vmem:[%s4019_s14 + $0xc] ss:$28 sps:$4 sm:$0xff]  }
 0x300   :  { %v2904_v12 = vld [vmem:[%s4019_s14 + $0x8] ss:$28 sps:$4 sm:$0xff]  }
 0x301   :  { %v1187_v15 = vpack.c.bf16 %v1186_v13, %v1186_v13  ;;  %v2912_v13 = vld [vmem:[%s4019_s14 + $0x354] ss:$28 sps:$4 sm:$0xff]  }
 0x303   :  { %2669 = vmatmul.mubr.msk.bf16.vlgmr.msra.gmra.mxu0 %vm1202_vm4, %v1187_v15  ;;  %v2918_v15 = vld [vmem:[%s4019_s14 + $0x31c] ss:$28 sps:$4 sm:$0xff]  }
 0x304   :  { %1324 = vmatpush1.bf16.msra.mxu0 %v2847_v14  ;;  %1347 = vmatprep.mubr.bf16.mxu0 %v3047_v46  ;;  %v2856_v46 = vld [vmem:[%s4013_s12] ss:$8 sps:$4 sm:$0xff]   ;;  %v2910_v14 = vld [vmem:[%s4019_s14 + $0x350] ss:$28 sps:$4 sm:$0xff]  }
 0x305   :  { %1325 = vmatprep.subr.bf16.mxu0 %v2852_v16  ;;  %v2916_v16 = vld [vmem:[%s4019_s14 + $0x318] ss:$28 sps:$4 sm:$0xff]  }
 0x308   :  { %1326 = vmatpush1.bf16.msra.mxu0 %v2850_v17  ;;  %v2924_v17 = vld [vmem:[%s4019_s14 + $0x2e4] ss:$28 sps:$4 sm:$0xff]  }
 0x309   :  { %1327 = vmatprep.subr.bf16.mxu0 %v2855_v18  ;;  %v2922_v18 = vld [vmem:[%s4019_s14 + $0x2e0] ss:$28 sps:$4 sm:$0xff]  }
 0x30c   :  { %1328 = vmatpush1.bf16.msra.mxu0 %v2853_v19  ;;  %v2930_v19 = vld [vmem:[%s4019_s14 + $0x2ac] ss:$28 sps:$4 sm:$0xff]  }
 0x30d   :  { %1329 = vmatprep.subr.bf16.mxu0 %v2858_v20  ;;  %v2928_v20 = vld [vmem:[%s4019_s14 + $0x2a8] ss:$28 sps:$4 sm:$0xff]  }
 0x310   :  { %1330 = vmatpush1.bf16.msra.mxu0 %v2856_v46  ;;  %v2936_v46 = vld [vmem:[%s4019_s14 + $0x274] ss:$28 sps:$4 sm:$0xff]  }
 0x311   :  { %2142 = vmatprep.subr.bf16.mxu0 %v2864_v23  ;;  %v2940_v23 = vld [vmem:[%s4019_s14 + $0x238] ss:$28 sps:$4 sm:$0xff]  }
 0x3c3   :  { %v1244_v52 = vpop.f32.mrf.mxu0 }
 0x3c4   :  { %v1245_v53 = vadd.f32 %v2455_v51, %v1244_v52  ;;  %v2963_v51 = vld [vmem:[%s4019_s14 + $0x328] ss:$28 sps:$4 sm:$0xff]   ;;  %v2960_v52 = vld [vmem:[%s4019_s14 + $0x160] ss:$28 sps:$4 sm:$0xff]  }
 0x3c5   :  { %v2670_v54 = vpop.f32.mrf.mxu0 }
 0x3c6   :  { %v1250_v55 = vmax.f32 %v1245_v53, 0.0  ;;  %v2964_v53 = vld [vmem:[%s4019_s14 + $0x168] ss:$28 sps:$4 sm:$0xff]  }
 0x3c7   :  { %v1247_v56 = vpop.f32.mrf.mxu0  ;;  %v2967_v54 = vld [vmem:[%s4019_s14 + $0x12c] ss:$28 sps:$4 sm:$0xff]  }
 0x3c8   :  { %v1251_v58 = vpack.c.bf16 %v1250_v55, %v1250_v55  ;;  %v2968_v55 = vld [vmem:[%s4019_s14 + $0x2f0] ss:$28 sps:$4 sm:$0xff]   ;;  %v2965_v56 = vld [vmem:[%s4019_s14 + $0x128] ss:$28 sps:$4 sm:$0xff]  }
 0x3c9   :  { %v2671_v60 = vpop.f32.mrf.mxu0 }
 0x3ca   :  { %2466 = vmatmul.mubr.msk.bf16.vlgmr.msra.gmra.mxu0 %vm1059_vm2, %v1251_v58  ;;  %v2972_v58 = vld [vmem:[%s4019_s14 + $0xf4] ss:$28 sps:$4 sm:$0xff]  }
 0x3cb   :  { %2143 = vmatpush1.bf16.msra.mxu0 %v2862_v57  ;;  %v2969_v57 = vld [vmem:[%s4019_s14 + $0x130] ss:$28 sps:$4 sm:$0xff]  }
 0x3cc   :  { %2144 = vmatprep.subr.bf16.mxu0 %v2870_v59  ;;  %v2973_v59 = vld [vmem:[%s4019_s14 + $0x2b8] ss:$28 sps:$4 sm:$0xff]   ;;  %v2970_v60 = vld [vmem:[%s4019_s14 + $0xf0] ss:$28 sps:$4 sm:$0xff]  }
 0x3cf   :  { %2145 = vmatpush1.bf16.msra.mxu0 %v2868_v61  ;;  %v2974_v61 = vld [vmem:[%s4019_s14 + $0xf8] ss:$28 sps:$4 sm:$0xff]  }
 0x3d0   :  { %2146 = vmatprep.subr.bf16.mxu0 %v2876_v62  ;;  %v2977_v62 = vld [vmem:[%s4019_s14 + $0xbc] ss:$28 sps:$4 sm:$0xff]  }
 0x3d3   :  { %2147 = vmatpush1.bf16.msra.mxu0 %v2874_v63  ;;  %v2978_v63 = vld [vmem:[%s4019_s14 + $0x280] ss:$28 sps:$4 sm:$0xff]  }
 0x3d4   :  { %2148 = vmatprep.subr.bf16.mxu0 %v2882_v0  ;;  %v2975_v0 = vld [vmem:[%s4019_s14 + $0xb8] ss:$28 sps:$4 sm:$0xff]  }
 0x3d7   :  { %2149 = vmatpush1.bf16.msra.mxu0 %v2880_v1  ;;  %v2979_v1 = vld [vmem:[%s4019_s14 + $0xc0] ss:$28 sps:$4 sm:$0xff]  }
 0x3d8   :  { %2150 = vmatprep.subr.bf16.mxu0 %v2888_v2  ;;  %v2982_v2 = vld [vmem:[%s4019_s14 + $0x84] ss:$28 sps:$4 sm:$0xff]  }
 0x3db   :  { %2151 = vmatpush1.bf16.msra.mxu0 %v2886_v5  ;;  %v2983_v5 = vld [vmem:[%s4019_s14 + $0x248] ss:$28 sps:$4 sm:$0xff]  }
 0x3dc   :  { %2152 = vmatprep.subr.bf16.mxu0 %v2894_v7  ;;  %v2980_v7 = vld [vmem:[%s4019_s14 + $0x80] ss:$28 sps:$4 sm:$0xff]  }
 0x3df   :  { %2153 = vmatpush1.bf16.msra.mxu0 %v2892_v8  ;;  %v2984_v8 = vld [vmem:[%s4019_s14 + $0x88] ss:$28 sps:$4 sm:$0xff]  }
 0x3e0   :  { %2154 = vmatprep.subr.bf16.mxu0 %v2900_v9  ;;  %v2987_v9 = vld [vmem:[%s4019_s14 + $0x4c] ss:$28 sps:$4 sm:$0xff]  }
 0x3e3   :  { %2155 = vmatpush1.bf16.msra.mxu0 %v2898_v10  ;;  %v2988_v10 = vld [vmem:[%s4019_s14 + $0x210] ss:$28 sps:$4 sm:$0xff]  }
 0x3e4   :  { %2156 = vmatprep.subr.bf16.mxu0 %v2906_v11  ;;  %v2985_v11 = vld [vmem:[%s4019_s14 + $0x48] ss:$28 sps:$4 sm:$0xff]  }
 0x3e7   :  { %2157 = vmatpush1.bf16.msra.mxu0 %v2904_v12  ;;  %v2989_v12 = vld [vmem:[%s4019_s14 + $0x50] ss:$28 sps:$4 sm:$0xff]  }
 0x3e8   :  { %2158 = vmatprep.subr.bf16.mxu0 %v2912_v13  ;;  %v2992_v13 = vld [vmem:[%s4019_s14 + $0x14] ss:$28 sps:$4 sm:$0xff]  }
 0x3eb   :  { %2159 = vmatpush2.bf16.msra.mxu0 %v2910_v14  ;;  %v2993_v14 = vld [vmem:[%s4019_s14 + $0x1d8] ss:$28 sps:$4 sm:$0xff]  }
 0x3ec   :  { %2160 = vmatprep.subr.bf16.mxu0 %v2918_v15  ;;  %v2990_v15 = vld [vmem:[%s4019_s14 + $0x10] ss:$28 sps:$4 sm:$0xff]  }
 0x3ef   :  { %2161 = vmatpush2.bf16.msra.mxu0 %v2916_v16  ;;  %v2994_v16 = vld [vmem:[%s4019_s14 + $0x18] ss:$28 sps:$4 sm:$0xff]  }
 0x3f0   :  { %2162 = vmatprep.subr.bf16.mxu0 %v2924_v17  ;;  %v2997_v17 = vld [vmem:[%s4019_s14 + $0x35c] ss:$28 sps:$4 sm:$0xff]  }
 0x3f3   :  { %2163 = vmatpush2.bf16.msra.mxu0 %v2922_v18  ;;  %v2995_v18 = vld [vmem:[%s4019_s14 + $0x358] ss:$28 sps:$4 sm:$0xff]  }
 0x3f4   :  { %2164 = vmatprep.subr.bf16.mxu0 %v2930_v19  ;;  %v3000_v19 = vld [vmem:[%s4019_s14 + $0x324] ss:$28 sps:$4 sm:$0xff]  }
 0x3f7   :  { %2165 = vmatpush2.bf16.msra.mxu0 %v2928_v20  ;;  %v2998_v20 = vld [vmem:[%s4019_s14 + $0x320] ss:$28 sps:$4 sm:$0xff]  }
 0x3f8   :  { %2166 = vmatprep.subr.bf16.mxu0 %v2936_v46  ;;  %v3003_v46 = vld [vmem:[%s4019_s14 + $0x2ec] ss:$28 sps:$4 sm:$0xff]  }
 0x3fb   :  { %2167 = vmatpush2.bf16.msra.mxu0 %v2934_v21  ;;  %v3001_v21 = vld [vmem:[%s4019_s14 + $0x2e8] ss:$28 sps:$4 sm:$0xff]  }
 0x3fc   :  { %2168 = vmatprep.subr.bf16.mxu0 %v2942_v22  ;;  %v3006_v22 = vld [vmem:[%s4019_s14 + $0x2b4] ss:$28 sps:$4 sm:$0xff]  }
 0x3ff   :  { %2169 = vmatpush2.bf16.msra.mxu0 %v2940_v23  ;;  %v3004_v23 = vld [vmem:[%s4019_s14 + $0x2b0] ss:$28 sps:$4 sm:$0xff]  }
 0x400   :  { %2170 = vmatprep.subr.bf16.mxu0 %v2948_v25  ;;  %v3007_v25 = vld [vmem:[%s4019_s14 + $0x278] ss:$28 sps:$4 sm:$0xff]  }
 0x403   :  { %2171 = vmatpush2.bf16.msra.mxu0 %v2946_v27  ;;  %v3010_v27 = vld [vmem:[%s4019_s14 + $0x240] ss:$28 sps:$4 sm:$0xff]  }
 0x404   :  { %2172 = vmatprep.subr.bf16.mxu0 %v2954_v29  ;;  %v3013_v29 = vld [vmem:[%s4019_s14 + $0x208] ss:$28 sps:$4 sm:$0xff]  }
 0x407   :  { %2173 = vmatpush2.bf16.msra.mxu0 %v2952_v31  ;;  %v3016_v31 = vld [vmem:[%s4019_s14 + $0x1d0] ss:$28 sps:$4 sm:$0xff]  }
 0x408   :  { %2620 = vmatprep.subr.bf16.mxu0 %v2958_v33  ;;  %v3968_v33 = vld [vmem:[%s4022_s15] sm:$0x7f] }
 0x48a   :  { %v1349_v37 = vpop.f32.mrf.mxu0 }
 0x48b   :  { %v1350_v38 = vadd.f32 %v1349_v37, %v1265_v35  ;;  %v1493_v35 = vrot.slane %v3968_v33, %v3515_v4  ;;  %v1497_v37 = vrot.slane %v3968_v33, %v3521_v6 }
 0x48c   :  { %v1351_v39 = vpop.f32.mrf.mxu0 }
 0x48d   :  { %v1352_v40 = vadd.f32 %v1351_v39, %v1269_v36  ;;  %v1356_v41 = vmax.f32 %v1350_v38, 0.0  ;;  %v1501_v36 = vrot.slane %v3968_v33, %v1500_v32  ;;  %v1505_v38 = vrot.slane %v3968_v33, %v1504_v34 }
 0x48e   :  { %v1353_v42 = vpop.f32.mrf.mxu0 }
 0x48f   :  { %v1357_v43 = vmax.f32 %v1352_v40, 0.0  ;;  %v3826_v49 = vpack.c.bf16 %v1356_v41, %v1356_v41 }
 0x490   :  { %v1354_v44 = vpop.f32.mrf.mxu0 }
 0x491   :  { %v1359_v45 = vpack.c.bf16 %v1357_v43, %v1357_v43 }
 0x493   :  { %2133 = vmatprep.mubr.bf16.mxu1 %v1359_v45  ;;  %2174 = vmatprep.mubr.bf16.mxu0 %v1359_v45 }
 0x494   :  { %2134 = vmatmul.mubr.bf16.vlgmr.msra.gmra.mxu1 %v3826_v49  ;;  %2175 = vmatmul.mubr.bf16.vlgmr.msra.gmra.mxu0 %v3826_v49 }
 0x495   :  { %2184 = vmatpush1.bf16.msra.mxu1 %v2955_v47  ;;  %2621 = vmatpush3.bf16.msra.mxu0 %v2959_v48 }
 0x496   :  { %2215 = vmatprep.mubr.bf16.mxu1 %v1359_v45  ;;  %2256 = vmatprep.mubr.bf16.mxu0 %v1359_v45 }
 0x497   :  { %2185 = vmatprep.subr.bf16.mxu1 %v2962_v50  ;;  %2622 = vmatprep.subr.bf16.mxu0 %v2963_v51 }
 0x499   :  { %2186 = vmatpush1.bf16.msra.mxu1 %v2960_v52  ;;  %2623 = vmatpush3.bf16.msra.mxu0 %v2964_v53 }
 0x49a   :  { %2187 = vmatprep.subr.bf16.mxu1 %v2967_v54  ;;  %2624 = vmatprep.subr.bf16.mxu0 %v2968_v55 }
 0x49d   :  { %2188 = vmatpush1.bf16.msra.mxu1 %v2965_v56  ;;  %2625 = vmatpush3.bf16.msra.mxu0 %v2969_v57 }
 0x49e   :  { %2189 = vmatprep.subr.bf16.mxu1 %v2972_v58  ;;  %2626 = vmatprep.subr.bf16.mxu0 %v2973_v59 }
 0x4a1   :  { %2190 = vmatpush1.bf16.msra.mxu1 %v2970_v60  ;;  %2627 = vmatpush3.bf16.msra.mxu0 %v2974_v61 }
 0x4a2   :  { %2191 = vmatprep.subr.bf16.mxu1 %v2977_v62  ;;  %2628 = vmatprep.subr.bf16.mxu0 %v2978_v63  ;;  %v1516_v62 = vsub.s32 6, %v3512_v3 }
 0x4a5   :  { %2192 = vmatpush1.bf16.msra.mxu1 %v2975_v0  ;;  %2629 = vmatpush3.bf16.msra.mxu0 %v2979_v1  ;;  %v1517_v0 = vrot.slane %v3968_v33, %v1516_v62 }
 0x4a6   :  { %2193 = vmatprep.subr.bf16.mxu1 %v2982_v2  ;;  %2630 = vmatprep.subr.bf16.mxu0 %v2983_v5 }
 0x4a9   :  { %2194 = vmatpush1.bf16.msra.mxu1 %v2980_v7  ;;  %2631 = vmatpush3.bf16.msra.mxu0 %v2984_v8 }
 0x4aa   :  { %2195 = vmatprep.subr.bf16.mxu1 %v2987_v9  ;;  %2632 = vmatprep.subr.bf16.mxu0 %v2988_v10 }
 0x4ad   :  { %2196 = vmatpush1.bf16.msra.mxu1 %v2985_v11  ;;  %2633 = vmatpush3.bf16.msra.mxu0 %v2989_v12 }
 0x4ae   :  { %2197 = vmatprep.subr.bf16.mxu1 %v2992_v13  ;;  %2634 = vmatprep.subr.bf16.mxu0 %v2993_v14 }
 0x4b1   :  { %2198 = vmatpush1.bf16.msra.mxu1 %v2990_v15  ;;  %2635 = vmatpush3.bf16.msra.mxu0 %v2994_v16  ;;  %v1508_v16 = vsub.s32 4, %v3512_v3 }
 0x4b2   :  { %2199 = vmatprep.subr.bf16.mxu1 %v2997_v17  ;;  %v1512_v17 = vsub.s32 5, %v3512_v3 }
 0x4b4   :  { %2257 = vmatmul.mubr.bf16.vlgmr.msra.gmra.mxu0 %v3826_v49 }
 0x4b5   :  { %2200 = vmatpush2.bf16.msra.mxu1 %v2995_v18  ;;  %v1509_v18 = vrot.slane %v3968_v33, %v1508_v16 }
 0x4b6   :  { %2201 = vmatprep.subr.bf16.mxu1 %v3000_v19  ;;  %v1513_v19 = vrot.slane %v3968_v33, %v1512_v17 }
 0x4b9   :  { %2202 = vmatpush2.bf16.msra.mxu1 %v2998_v20 }
 0x4ba   :  { %2203 = vmatprep.subr.bf16.mxu1 %v3003_v46 }
 0x4bd   :  { %2204 = vmatpush2.bf16.msra.mxu1 %v3001_v21 }
 0x4be   :  { %2205 = vmatprep.subr.bf16.mxu1 %v3006_v22 }
 0x4c1   :  { %2206 = vmatpush2.bf16.msra.mxu1 %v3004_v23 }
 0x4c2   :  { %2207 = vmatprep.subr.bf16.mxu1 %v3009_v24 }
 0x4c5   :  { %2208 = vmatpush2.bf16.msra.mxu1 %v3007_v25 }
 0x4c6   :  { %2209 = vmatprep.subr.bf16.mxu1 %v3012_v26 }
 0x4c9   :  { %2210 = vmatpush2.bf16.msra.mxu1 %v3010_v27 }
 0x4ca   :  { %2211 = vmatprep.subr.bf16.mxu1 %v3015_v28 }
 0x4cd   :  { %2212 = vmatpush2.bf16.msra.mxu1 %v3013_v29 }
 0x4ce   :  { %2213 = vmatprep.subr.bf16.mxu1 %v3018_v30 }
 0x4d1   :  { %2214 = vmatpush2.bf16.msra.mxu1 %v3016_v31 }
 0x4d4   :  { %2216 = vmatmul.mubr.bf16.vlgmr.msra.gmra.mxu1 %v3826_v49 }
 0x554   :  { %v2135_v39 = vpop.f32.mrf.mxu1  ;;  %v2176_v40 = vpop.f32.mrf.mxu0 }
 0x555   :  { %v2136_v41 = vadd.f32 %v2135_v39, %v1493_v35  ;;  %v2177_v42 = vadd.f32 %v2176_v40, %v1501_v36 }
 0x556   :  { %v2137_v43 = vpop.f32.mrf.mxu1  ;;  %v2178_v44 = vpop.f32.mrf.mxu0 }
 0x557   :  { %v2579_v45 = vmul.f32 -1.442695, %v2136_v41  ;;  %v2581_v47 = vmul.f32 -1.442695, %v2177_v42  ;;  %v2138_v48 = vadd.f32 %v2137_v43, %v1497_v37  ;;  %v2179_v49 = vadd.f32 %v2178_v44, %v1505_v38 }
 0x558   :  { %v2139_v50 = vpop.f32.mrf.mxu1  ;;  %v2180_v51 = vpop.f32.mrf.mxu0 }
 0x559   :  { %3019 = vpow2.f32 %v2579_v45  ;;  %v2580_v4 = vmul.f32 -1.442695, %v2138_v48  ;;  %v2582_v52 = vmul.f32 -1.442695, %v2179_v49 }
 0x55a   :  { %3021 = vpow2.f32 %v2581_v47  ;;  %v2140_v53 = vpop.f32.mrf.mxu1  ;;  %v2181_v6 = vpop.f32.mrf.mxu0 }
 0x55b   :  { %3023 = vpow2.f32 %v2580_v4 }
 0x55c   :  { %3025 = vpow2.f32 %v2582_v52 }
 0x566   :  { %v3020_v54 = vpop.eup %3019 }
 0x567   :  { %v3022_v55 = vpop.eup %3021  ;;  %v2285_v56 = vadd.f32 1.0, %v3020_v54 }
 0x568   :  { %v3024_v57 = vpop.eup %3023  ;;  %v2287_v58 = vadd.f32 1.0, %v3022_v55 }
 0x569   :  { %v3026_v59 = vpop.eup %3025  ;;  %3027 = vrcp.f32 %v2285_v56  ;;  %v2286_v60 = vadd.f32 1.0, %v3024_v57 }
 0x56a   :  { %3029 = vrcp.f32 %v2287_v58  ;;  %v2288_v61 = vadd.f32 1.0, %v3026_v59 }
 0x56b   :  { %3031 = vrcp.f32 %v2286_v60 }
 0x56c   :  { %3033 = vrcp.f32 %v2288_v61 }
 0x574   :  { %v2636_v63 = vpop.f32.mrf.mxu0 }
 0x576   :  { %v3028_v1 = vpop.eup %3027  ;;  %v2637_v2 = vpop.f32.mrf.mxu0 }
 0x577   :  { %v3030_v5 = vpop.eup %3029  ;;  %2306 = vst [vmem:[%s4023_s16] sm:$0xff] %v3028_v1  ;;  %v2638_v7 = vadd.f32 %v2637_v2, %v2636_v63 }
 0x578   :  { %v3032_v8 = vpop.eup %3031  ;;  %2308 = vst [vmem:[%s4023_s16 + $0x10] sm:$0xff] %v3030_v5  ;;  %v2639_v9 = vpop.f32.mrf.mxu0 }
 0x579   :  { %v3034_v10 = vpop.eup %3033  ;;  %2307 = vst [vmem:[%s4023_s16 + $0x8] sm:$0xff] %v3032_v8  ;;  %v2259_v11 = vadd.f32 %v2638_v7, %v1517_v0 }
 0x57a   :  { %2309 = vst [vmem:[%s4023_s16 + $0x18] sm:$0xff] %v3034_v10  ;;  %v2640_v12 = vpop.f32.mrf.mxu0 }
 0x57b   :  { %v2585_v13 = vmul.f32 -1.442695, %v2259_v11 }
 0x57d   :  { %3035 = vpow2.f32 %v2585_v13 }
 0x58a   :  { %v3036_v14 = vpop.eup %3035 }
 0x58b   :  { %v2291_v15 = vadd.f32 1.0, %v3036_v14 }
 0x58d   :  { %3037 = vrcp.f32 %v2291_v15 }
 0x594   :  { %v2217_v20 = vpop.f32.mrf.mxu1 }
 0x595   :  { %v2218_v46 = vadd.f32 %v2217_v20, %v1509_v18 }
 0x596   :  { %v2219_v21 = vpop.f32.mrf.mxu1 }
 0x597   :  { %v2583_v22 = vmul.f32 -1.442695, %v2218_v46  ;;  %v2220_v23 = vadd.f32 %v2219_v21, %v1513_v19 }
 0x598   :  { %v2221_v24 = vpop.f32.mrf.mxu1 }
 0x599   :  { %3039 = vpow2.f32 %v2583_v22  ;;  %v2584_v25 = vmul.f32 -1.442695, %v2220_v23 }
 0x59a   :  { %v3038_v26 = vpop.eup %3037  ;;  %v2222_v27 = vpop.f32.mrf.mxu1 }
 0x59b   :  { %2312 = vst.msk [vmem:[%s4023_s16 + $0x30] sm:$0xff] %vm671_vm0, %v3038_v26  ;;  %3041 = vpow2.f32 %v2584_v25 }
 0x5a6   :  { %v3040_v3 = vpop.eup %3039 }
 0x5a7   :  { %v2289_v28 = vadd.f32 1.0, %v3040_v3 }
 0x5a8   :  { %v3042_v29 = vpop.eup %3041 }
 0x5a9   :  { %3043 = vrcp.f32 %v2289_v28  ;;  %v2290_v30 = vadd.f32 1.0, %v3042_v29 }
 0x5ab   :  { %3045 = vrcp.f32 %v2290_v30 }
 0x5b6   :  { %v3044_v31 = vpop.eup %3043 }
 0x5b7   :  { %2310 = vst [vmem:[%s4023_s16 + $0x20] sm:$0xff] %v3044_v31 }
 0x5b8   :  { %v3046_v32 = vpop.eup %3045 }
 0x5b9   :  { %2311 = vst [vmem:[%s4023_s16 + $0x28] sm:$0xff] %v3046_v32 }

</bundles_post_ra>
